<compile_context>
chip_gen: v6e
topology: v6e:2x2x1
jax: 0.10.0
libtpu: 0.0.40
codegen_flags: <defaults>
</compile_context>

<pallas_src>
import functools

import jax
import jax.numpy as jnp
from jax.experimental import pallas as pl
from jax.experimental.pallas import tpu as pltpu

KSIZE = 7
PAD = 3  # padding=3 for kernel_size=7


def _spatial_attention_kernel(x_ref, w_ref, o_ref, maps_ref, *,
                              C, H, W, Bt, Wp, Wfull):
    """One grid step: Bt batch elements packed along the lane dimension.

    x_ref:    (Bt, C, H, W)   VMEM  unpadded input block
    w_ref:    (2*7*7,)        SMEM  conv weights [c, kh, kw]; avg half already / C
    o_ref:    (1, H, Bt*Wp)   VMEM  packed sigmoid(conv) output
    maps_ref: (2, Hp, Wfull)  VMEM  zero-padded packed [sum, max] maps scratch
    """
    Wout = Bt * Wp

    # Zero the packed-map scratch: this provides the conv zero padding and the
    # gaps between batch slabs.  Done every step (not just step 0) so it is
    # safe if the "parallel" batch axis is split across TensorCores.
    maps_ref[...] = jnp.zeros_like(maps_ref)

    # ---- Fused single-pass channel sum + max, written into padded slabs. ----
    # Slab b occupies packed columns [b*Wp, (b+1)*Wp); its data sits at
    # rows [PAD, PAD+H), columns [b*Wp+PAD, b*Wp+PAD+W).
    for b in range(Bt):
        v = x_ref[b, 0].astype(jnp.float32)
        s = v
        m = v
        for c in range(1, C):
            v = x_ref[b, c].astype(jnp.float32)
            s = s + v
            m = jnp.maximum(m, v)
        col = b * Wp + PAD
        maps_ref[0, PAD:PAD + H, col:col + W] = s   # 1/C folded into weights
        maps_ref[1, PAD:PAD + H, col:col + W] = m

    # ---- 7x7 / 2-channel conv with hoisted shifts. ----
    #   A[kw][i, j] = sum_{c,kh} w[c,kh,kw] * maps[c, i+kh, j]
    #   acc[i, q]   = sum_{kw}   A[kw][i, q+kw]
    acc_kw = [jnp.zeros((H, Wfull), jnp.float32) for _ in range(KSIZE)]
    for c in range(2):
        for kh in range(KSIZE):
            row = maps_ref[c, kh:kh + H, :]            # (H, Wfull)
            base = c * KSIZE * KSIZE + kh * KSIZE
            for kw in range(KSIZE):
                acc_kw[kw] = acc_kw[kw] + w_ref[base + kw] * row

    acc = acc_kw[0][:, 0:Wout]
    for kw in range(1, KSIZE):
        acc = acc + acc_kw[kw][:, kw:kw + Wout]

    o_ref[0] = jax.nn.sigmoid(acc).astype(o_ref.dtype)


def spatial_attention(x, weight):
    """x: (B, C, H, W) float.  weight: (1, 2, 7, 7) float (Conv2d, no bias).

    Returns (B, 1, H, W), matching
        sigmoid(Conv2d(2,1,7,pad=3,bias=False)(cat([mean_c(x), max_c(x)], 1)))
    """
    B, C, H, W = x.shape
    Hp, Wp = H + 2 * PAD, W + 2 * PAD

    # Pack Bt batch elements along lanes: largest divisor of B whose packed
    # width stays within one 128-lane tile.  (For larger B this also keeps the
    # grid extent >= 2 for v7x's two TensorCores.)
    bt_cap = max(1, 128 // Wp)
    Bt = 1
    for d in range(1, B + 1):
        if B % d == 0 and d <= bt_cap:
            Bt = d
    G = B // Bt
    Wout = Bt * Wp
    Wfull = Wout + 2 * PAD

    # Fold the 1/C mean normalization into the avg-channel weights, flatten for
    # SMEM scalar reads (index = c*49 + kh*7 + kw).
    w2 = weight.astype(jnp.float32).reshape(2, KSIZE * KSIZE)
    w_flat = jnp.concatenate([w2[0] / C, w2[1]]).reshape(-1)   # (98,)

    kernel = functools.partial(_spatial_attention_kernel,
                               C=C, H=H, W=W, Bt=Bt, Wp=Wp, Wfull=Wfull)

    out_packed = pl.pallas_call(
        kernel,
        out_shape=jax.ShapeDtypeStruct((G, H, Wout), jnp.float32),
        grid_spec=pltpu.PrefetchScalarGridSpec(
            num_scalar_prefetch=0,
            grid=(G,),
            in_specs=[
                pl.BlockSpec((Bt, C, H, W), lambda g: (g, 0, 0, 0)),
                pl.BlockSpec(memory_space=pltpu.SMEM),
            ],
            out_specs=pl.BlockSpec((1, H, Wout), lambda g: (g, 0, 0)),
            scratch_shapes=[pltpu.VMEM((2, Hp, Wfull), jnp.float32)],
        ),
        compiler_params=pltpu.CompilerParams(
            dimension_semantics=("parallel",),
            vmem_limit_bytes=32 * 1024 * 1024),
    )(x, w_flat)

    # Unpack lanes: slab b's valid output lives in packed columns
    # [b*Wp, b*Wp + W).  (G, H, Bt*Wp) -> (B, 1, H, W).
    out = out_packed.reshape(G, H, Bt, Wp).transpose(0, 2, 1, 3)
    out = out.reshape(B, H, Wp)[:, :, :W]
    return out[:, None, :, :].astype(x.dtype)


def spatial_attention_ref(x, weight):
    """Pure-JAX reference mirroring the PyTorch module."""
    avg_out = jnp.mean(x, axis=1, keepdims=True)
    max_out = jnp.max(x, axis=1, keepdims=True)
    cat = jnp.concatenate([avg_out, max_out], axis=1)  # (B, 2, H, W)
    out = jax.lax.conv_general_dilated(
        cat, weight,
        window_strides=(1, 1),
        padding=((PAD, PAD), (PAD, PAD)),
        dimension_numbers=("NCHW", "OIHW", "NCHW"),
    )
    return jax.nn.sigmoid(out)


if __name__ == "__main__":
    key = jax.random.PRNGKey(0)
    kx, kw_key = jax.random.split(key)

    B, C, H, W = 2, 4, 16, 16
    x = jax.random.normal(kx, (B, C, H, W), dtype=jnp.float32)
    # Conv2d(2, 1, 7, bias=False) weight shape.
    weight = jax.random.normal(kw_key, (1, 2, KSIZE, KSIZE), dtype=jnp.float32) * 0.1

    out = spatial_attention(x, weight)
    out = jax.block_until_ready(out)

    ref = spatial_attention_ref(x, weight)
    assert out.shape == (B, 1, H, W), out.shape
    assert jnp.allclose(out, ref, atol=1e-5, rtol=1e-5), (
        float(jnp.max(jnp.abs(out - ref))))

    print("KERNEL_OK")
</pallas_src>

<mosaic_0001>
module attributes {stable_mosaic.version = 11 : i64} {
  func.func @_spatial_attention_kernel(%arg0: i32, %arg1: memref<2x4x16x16xf32, #tpu.memory_space<vmem>>, %arg2: memref<98xf32, #tpu.memory_space<smem>>, %arg3: memref<1x16x44xf32, #tpu.memory_space<vmem>>, %arg4: memref<2x22x50xf32, #tpu.memory_space<vmem>>) attributes {dimension_semantics = [#tpu.dimension_semantics<parallel>], iteration_bounds = array<i64: 1>, scalar_prefetch = 0 : i64, scratch_operands = 1 : i64, tpu.core_type = #tpu.core_type<tc>, window_params = [{transform_indices = @transform_0, window_bounds = array<i64: 2, 4, 16, 16>}, {transform_indices = @transform_1, window_bounds = array<i64: 98>}, {transform_indices = @transform_2, window_bounds = array<i64: 1, 16, 44>}]} {
    %cst = arith.constant 0.000000e+00 : f32
    %0 = vector.broadcast %cst : f32 to vector<2x22x50xf32>
    %c0 = arith.constant 0 : index
    %c0_0 = arith.constant 0 : index
    %c0_1 = arith.constant 0 : index
    %1 = vector.load %arg4[%c0, %c0_0, %c0_1] : memref<2x22x50xf32, #tpu.memory_space<vmem>>, vector<2x22x50xf32>
    tpu.vector_store %arg4[%c0, %c0_0, %c0_1], %0 {strides = array<i32>} : memref<2x22x50xf32, #tpu.memory_space<vmem>>, vector<2x22x50xf32>,
    %c0_2 = arith.constant 0 : index
    %c0_3 = arith.constant 0 : index
    %c0_4 = arith.constant 0 : index
    %c0_5 = arith.constant 0 : index
    %2 = vector.load %arg1[%c0_2, %c0_3, %c0_4, %c0_5] : memref<2x4x16x16xf32, #tpu.memory_space<vmem>>, vector<1x1x16x16xf32>
    %3 = vector.shape_cast %2 : vector<1x1x16x16xf32> to vector<16x16xf32>
    %c0_6 = arith.constant 0 : index
    %c1 = arith.constant 1 : index
    %c0_7 = arith.constant 0 : index
    %c0_8 = arith.constant 0 : index
    %4 = vector.load %arg1[%c0_6, %c1, %c0_7, %c0_8] : memref<2x4x16x16xf32, #tpu.memory_space<vmem>>, vector<1x1x16x16xf32>
    %5 = vector.shape_cast %4 : vector<1x1x16x16xf32> to vector<16x16xf32>
    %6 = arith.addf %3, %5 : vector<16x16xf32>
    %7 = arith.maximumf %3, %5 : vector<16x16xf32>
    %c0_9 = arith.constant 0 : index
    %c2 = arith.constant 2 : index
    %c0_10 = arith.constant 0 : index
    %c0_11 = arith.constant 0 : index
    %8 = vector.load %arg1[%c0_9, %c2, %c0_10, %c0_11] : memref<2x4x16x16xf32, #tpu.memory_space<vmem>>, vector<1x1x16x16xf32>
    %9 = vector.shape_cast %8 : vector<1x1x16x16xf32> to vector<16x16xf32>
    %10 = arith.addf %6, %9 : vector<16x16xf32>
    %11 = arith.maximumf %7, %9 : vector<16x16xf32>
    %c0_12 = arith.constant 0 : index
    %c3 = arith.constant 3 : index
    %c0_13 = arith.constant 0 : index
    %c0_14 = arith.constant 0 : index
    %12 = vector.load %arg1[%c0_12, %c3, %c0_13, %c0_14] : memref<2x4x16x16xf32, #tpu.memory_space<vmem>>, vector<1x1x16x16xf32>
    %13 = vector.shape_cast %12 : vector<1x1x16x16xf32> to vector<16x16xf32>
    %14 = arith.addf %10, %13 : vector<16x16xf32>
    %15 = arith.maximumf %11, %13 : vector<16x16xf32>
    %c0_15 = arith.constant 0 : index
    %c3_16 = arith.constant 3 : index
    %c3_17 = arith.constant 3 : index
    %16 = vector.load %arg4[%c0_15, %c3_16, %c3_17] : memref<2x22x50xf32, #tpu.memory_space<vmem>>, vector<1x16x16xf32>
    %17 = vector.shape_cast %16 : vector<1x16x16xf32> to vector<16x16xf32>
    %18 = vector.shape_cast %14 : vector<16x16xf32> to vector<1x16x16xf32>
    tpu.vector_store %arg4[%c0_15, %c3_16, %c3_17], %18 {strides = array<i32>} : memref<2x22x50xf32, #tpu.memory_space<vmem>>, vector<1x16x16xf32>,
    %c1_18 = arith.constant 1 : index
    %c3_19 = arith.constant 3 : index
    %c3_20 = arith.constant 3 : index
    %19 = vector.load %arg4[%c1_18, %c3_19, %c3_20] : memref<2x22x50xf32, #tpu.memory_space<vmem>>, vector<1x16x16xf32>
    %20 = vector.shape_cast %19 : vector<1x16x16xf32> to vector<16x16xf32>
    %21 = vector.shape_cast %15 : vector<16x16xf32> to vector<1x16x16xf32>
    tpu.vector_store %arg4[%c1_18, %c3_19, %c3_20], %21 {strides = array<i32>} : memref<2x22x50xf32, #tpu.memory_space<vmem>>, vector<1x16x16xf32>,
    %c1_21 = arith.constant 1 : index
    %c0_22 = arith.constant 0 : index
    %c0_23 = arith.constant 0 : index
    %c0_24 = arith.constant 0 : index
    %22 = vector.load %arg1[%c1_21, %c0_22, %c0_23, %c0_24] : memref<2x4x16x16xf32, #tpu.memory_space<vmem>>, vector<1x1x16x16xf32>
    %23 = vector.shape_cast %22 : vector<1x1x16x16xf32> to vector<16x16xf32>
    %c1_25 = arith.constant 1 : index
    %c1_26 = arith.constant 1 : index
    %c0_27 = arith.constant 0 : index
    %c0_28 = arith.constant 0 : index
    %24 = vector.load %arg1[%c1_25, %c1_26, %c0_27, %c0_28] : memref<2x4x16x16xf32, #tpu.memory_space<vmem>>, vector<1x1x16x16xf32>
    %25 = vector.shape_cast %24 : vector<1x1x16x16xf32> to vector<16x16xf32>
    %26 = arith.addf %23, %25 : vector<16x16xf32>
    %27 = arith.maximumf %23, %25 : vector<16x16xf32>
    %c1_29 = arith.constant 1 : index
    %c2_30 = arith.constant 2 : index
    %c0_31 = arith.constant 0 : index
    %c0_32 = arith.constant 0 : index
    %28 = vector.load %arg1[%c1_29, %c2_30, %c0_31, %c0_32] : memref<2x4x16x16xf32, #tpu.memory_space<vmem>>, vector<1x1x16x16xf32>
    %29 = vector.shape_cast %28 : vector<1x1x16x16xf32> to vector<16x16xf32>
    %30 = arith.addf %26, %29 : vector<16x16xf32>
    %31 = arith.maximumf %27, %29 : vector<16x16xf32>
    %c1_33 = arith.constant 1 : index
    %c3_34 = arith.constant 3 : index
    %c0_35 = arith.constant 0 : index
    %c0_36 = arith.constant 0 : index
    %32 = vector.load %arg1[%c1_33, %c3_34, %c0_35, %c0_36] : memref<2x4x16x16xf32, #tpu.memory_space<vmem>>, vector<1x1x16x16xf32>
    %33 = vector.shape_cast %32 : vector<1x1x16x16xf32> to vector<16x16xf32>
    %34 = arith.addf %30, %33 : vector<16x16xf32>
    %35 = arith.maximumf %31, %33 : vector<16x16xf32>
    %c0_37 = arith.constant 0 : index
    %c3_38 = arith.constant 3 : index
    %c25 = arith.constant 25 : index
    %36 = vector.load %arg4[%c0_37, %c3_38, %c25] : memref<2x22x50xf32, #tpu.memory_space<vmem>>, vector<1x16x16xf32>
    %37 = vector.shape_cast %36 : vector<1x16x16xf32> to vector<16x16xf32>
    %38 = vector.shape_cast %34 : vector<16x16xf32> to vector<1x16x16xf32>
    tpu.vector_store %arg4[%c0_37, %c3_38, %c25], %38 {strides = array<i32>} : memref<2x22x50xf32, #tpu.memory_space<vmem>>, vector<1x16x16xf32>,
    %c1_39 = arith.constant 1 : index
    %c3_40 = arith.constant 3 : index
    %c25_41 = arith.constant 25 : index
    %39 = vector.load %arg4[%c1_39, %c3_40, %c25_41] : memref<2x22x50xf32, #tpu.memory_space<vmem>>, vector<1x16x16xf32>
    %40 = vector.shape_cast %39 : vector<1x16x16xf32> to vector<16x16xf32>
    %41 = vector.shape_cast %35 : vector<16x16xf32> to vector<1x16x16xf32>
    tpu.vector_store %arg4[%c1_39, %c3_40, %c25_41], %41 {strides = array<i32>} : memref<2x22x50xf32, #tpu.memory_space<vmem>>, vector<1x16x16xf32>,
    %cst_42 = arith.constant 0.000000e+00 : f32
    %42 = vector.broadcast %cst_42 : f32 to vector<16x50xf32>
    %cst_43 = arith.constant 0.000000e+00 : f32
    %43 = vector.broadcast %cst_43 : f32 to vector<16x50xf32>
    %cst_44 = arith.constant 0.000000e+00 : f32
    %44 = vector.broadcast %cst_44 : f32 to vector<16x50xf32>
    %cst_45 = arith.constant 0.000000e+00 : f32
    %45 = vector.broadcast %cst_45 : f32 to vector<16x50xf32>
    %cst_46 = arith.constant 0.000000e+00 : f32
    %46 = vector.broadcast %cst_46 : f32 to vector<16x50xf32>
    %cst_47 = arith.constant 0.000000e+00 : f32
    %47 = vector.broadcast %cst_47 : f32 to vector<16x50xf32>
    %cst_48 = arith.constant 0.000000e+00 : f32
    %48 = vector.broadcast %cst_48 : f32 to vector<16x50xf32>
    %c0_49 = arith.constant 0 : index
    %c0_50 = arith.constant 0 : index
    %c0_51 = arith.constant 0 : index
    %49 = vector.load %arg4[%c0_49, %c0_50, %c0_51] : memref<2x22x50xf32, #tpu.memory_space<vmem>>, vector<1x16x50xf32>
    %50 = vector.shape_cast %49 : vector<1x16x50xf32> to vector<16x50xf32>
    %c0_52 = arith.constant 0 : index
    %51 = memref.load %arg2[%c0_52] : memref<98xf32, #tpu.memory_space<smem>>
    %52 = vector.broadcast %51 : f32 to vector<16x50xf32>
    %53 = arith.mulf %52, %50 : vector<16x50xf32>
    %54 = arith.addf %42, %53 : vector<16x50xf32>
    %c1_53 = arith.constant 1 : index
    %55 = memref.load %arg2[%c1_53] : memref<98xf32, #tpu.memory_space<smem>>
    %56 = vector.broadcast %55 : f32 to vector<16x50xf32>
    %57 = arith.mulf %56, %50 : vector<16x50xf32>
    %58 = arith.addf %43, %57 : vector<16x50xf32>
    %c2_54 = arith.constant 2 : index
    %59 = memref.load %arg2[%c2_54] : memref<98xf32, #tpu.memory_space<smem>>
    %60 = vector.broadcast %59 : f32 to vector<16x50xf32>
    %61 = arith.mulf %60, %50 : vector<16x50xf32>
    %62 = arith.addf %44, %61 : vector<16x50xf32>
    %c3_55 = arith.constant 3 : index
    %63 = memref.load %arg2[%c3_55] : memref<98xf32, #tpu.memory_space<smem>>
    %64 = vector.broadcast %63 : f32 to vector<16x50xf32>
    %65 = arith.mulf %64, %50 : vector<16x50xf32>
    %66 = arith.addf %45, %65 : vector<16x50xf32>
    %c4 = arith.constant 4 : index
    %67 = memref.load %arg2[%c4] : memref<98xf32, #tpu.memory_space<smem>>
    %68 = vector.broadcast %67 : f32 to vector<16x50xf32>
    %69 = arith.mulf %68, %50 : vector<16x50xf32>
    %70 = arith.addf %46, %69 : vector<16x50xf32>
    %c5 = arith.constant 5 : index
    %71 = memref.load %arg2[%c5] : memref<98xf32, #tpu.memory_space<smem>>
    %72 = vector.broadcast %71 : f32 to vector<16x50xf32>
    %73 = arith.mulf %72, %50 : vector<16x50xf32>
    %74 = arith.addf %47, %73 : vector<16x50xf32>
    %c6 = arith.constant 6 : index
    %75 = memref.load %arg2[%c6] : memref<98xf32, #tpu.memory_space<smem>>
    %76 = vector.broadcast %75 : f32 to vector<16x50xf32>
    %77 = arith.mulf %76, %50 : vector<16x50xf32>
    %78 = arith.addf %48, %77 : vector<16x50xf32>
    %c0_56 = arith.constant 0 : index
    %c1_57 = arith.constant 1 : index
    %c0_58 = arith.constant 0 : index
    %79 = vector.load %arg4[%c0_56, %c1_57, %c0_58] : memref<2x22x50xf32, #tpu.memory_space<vmem>>, vector<1x16x50xf32>
    %80 = vector.shape_cast %79 : vector<1x16x50xf32> to vector<16x50xf32>
    %c7 = arith.constant 7 : index
    %81 = memref.load %arg2[%c7] : memref<98xf32, #tpu.memory_space<smem>>
    %82 = vector.broadcast %81 : f32 to vector<16x50xf32>
    %83 = arith.mulf %82, %80 : vector<16x50xf32>
    %84 = arith.addf %54, %83 : vector<16x50xf32>
    %c8 = arith.constant 8 : index
    %85 = memref.load %arg2[%c8] : memref<98xf32, #tpu.memory_space<smem>>
    %86 = vector.broadcast %85 : f32 to vector<16x50xf32>
    %87 = arith.mulf %86, %80 : vector<16x50xf32>
    %88 = arith.addf %58, %87 : vector<16x50xf32>
    %c9 = arith.constant 9 : index
    %89 = memref.load %arg2[%c9] : memref<98xf32, #tpu.memory_space<smem>>
    %90 = vector.broadcast %89 : f32 to vector<16x50xf32>
    %91 = arith.mulf %90, %80 : vector<16x50xf32>
    %92 = arith.addf %62, %91 : vector<16x50xf32>
    %c10 = arith.constant 10 : index
    %93 = memref.load %arg2[%c10] : memref<98xf32, #tpu.memory_space<smem>>
    %94 = vector.broadcast %93 : f32 to vector<16x50xf32>
    %95 = arith.mulf %94, %80 : vector<16x50xf32>
    %96 = arith.addf %66, %95 : vector<16x50xf32>
    %c11 = arith.constant 11 : index
    %97 = memref.load %arg2[%c11] : memref<98xf32, #tpu.memory_space<smem>>
    %98 = vector.broadcast %97 : f32 to vector<16x50xf32>
    %99 = arith.mulf %98, %80 : vector<16x50xf32>
    %100 = arith.addf %70, %99 : vector<16x50xf32>
    %c12 = arith.constant 12 : index
    %101 = memref.load %arg2[%c12] : memref<98xf32, #tpu.memory_space<smem>>
    %102 = vector.broadcast %101 : f32 to vector<16x50xf32>
    %103 = arith.mulf %102, %80 : vector<16x50xf32>
    %104 = arith.addf %74, %103 : vector<16x50xf32>
    %c13 = arith.constant 13 : index
    %105 = memref.load %arg2[%c13] : memref<98xf32, #tpu.memory_space<smem>>
    %106 = vector.broadcast %105 : f32 to vector<16x50xf32>
    %107 = arith.mulf %106, %80 : vector<16x50xf32>
    %108 = arith.addf %78, %107 : vector<16x50xf32>
    %c0_59 = arith.constant 0 : index
    %c2_60 = arith.constant 2 : index
    %c0_61 = arith.constant 0 : index
    %109 = vector.load %arg4[%c0_59, %c2_60, %c0_61] : memref<2x22x50xf32, #tpu.memory_space<vmem>>, vector<1x16x50xf32>
    %110 = vector.shape_cast %109 : vector<1x16x50xf32> to vector<16x50xf32>
    %c14 = arith.constant 14 : index
    %111 = memref.load %arg2[%c14] : memref<98xf32, #tpu.memory_space<smem>>
    %112 = vector.broadcast %111 : f32 to vector<16x50xf32>
    %113 = arith.mulf %112, %110 : vector<16x50xf32>
    %114 = arith.addf %84, %113 : vector<16x50xf32>
    %c15 = arith.constant 15 : index
    %115 = memref.load %arg2[%c15] : memref<98xf32, #tpu.memory_space<smem>>
    %116 = vector.broadcast %115 : f32 to vector<16x50xf32>
    %117 = arith.mulf %116, %110 : vector<16x50xf32>
    %118 = arith.addf %88, %117 : vector<16x50xf32>
    %c16 = arith.constant 16 : index
    %119 = memref.load %arg2[%c16] : memref<98xf32, #tpu.memory_space<smem>>
    %120 = vector.broadcast %119 : f32 to vector<16x50xf32>
    %121 = arith.mulf %120, %110 : vector<16x50xf32>
    %122 = arith.addf %92, %121 : vector<16x50xf32>
    %c17 = arith.constant 17 : index
    %123 = memref.load %arg2[%c17] : memref<98xf32, #tpu.memory_space<smem>>
    %124 = vector.broadcast %123 : f32 to vector<16x50xf32>
    %125 = arith.mulf %124, %110 : vector<16x50xf32>
    %126 = arith.addf %96, %125 : vector<16x50xf32>
    %c18 = arith.constant 18 : index
    %127 = memref.load %arg2[%c18] : memref<98xf32, #tpu.memory_space<smem>>
    %128 = vector.broadcast %127 : f32 to vector<16x50xf32>
    %129 = arith.mulf %128, %110 : vector<16x50xf32>
    %130 = arith.addf %100, %129 : vector<16x50xf32>
    %c19 = arith.constant 19 : index
    %131 = memref.load %arg2[%c19] : memref<98xf32, #tpu.memory_space<smem>>
    %132 = vector.broadcast %131 : f32 to vector<16x50xf32>
    %133 = arith.mulf %132, %110 : vector<16x50xf32>
    %134 = arith.addf %104, %133 : vector<16x50xf32>
    %c20 = arith.constant 20 : index
    %135 = memref.load %arg2[%c20] : memref<98xf32, #tpu.memory_space<smem>>
    %136 = vector.broadcast %135 : f32 to vector<16x50xf32>
    %137 = arith.mulf %136, %110 : vector<16x50xf32>
    %138 = arith.addf %108, %137 : vector<16x50xf32>
    %c0_62 = arith.constant 0 : index
    %c3_63 = arith.constant 3 : index
    %c0_64 = arith.constant 0 : index
    %139 = vector.load %arg4[%c0_62, %c3_63, %c0_64] : memref<2x22x50xf32, #tpu.memory_space<vmem>>, vector<1x16x50xf32>
    %140 = vector.shape_cast %139 : vector<1x16x50xf32> to vector<16x50xf32>
    %c21 = arith.constant 21 : index
    %141 = memref.load %arg2[%c21] : memref<98xf32, #tpu.memory_space<smem>>
    %142 = vector.broadcast %141 : f32 to vector<16x50xf32>
    %143 = arith.mulf %142, %140 : vector<16x50xf32>
    %144 = arith.addf %114, %143 : vector<16x50xf32>
    %c22 = arith.constant 22 : index
    %145 = memref.load %arg2[%c22] : memref<98xf32, #tpu.memory_space<smem>>
    %146 = vector.broadcast %145 : f32 to vector<16x50xf32>
    %147 = arith.mulf %146, %140 : vector<16x50xf32>
    %148 = arith.addf %118, %147 : vector<16x50xf32>
    %c23 = arith.constant 23 : index
    %149 = memref.load %arg2[%c23] : memref<98xf32, #tpu.memory_space<smem>>
    %150 = vector.broadcast %149 : f32 to vector<16x50xf32>
    %151 = arith.mulf %150, %140 : vector<16x50xf32>
    %152 = arith.addf %122, %151 : vector<16x50xf32>
    %c24 = arith.constant 24 : index
    %153 = memref.load %arg2[%c24] : memref<98xf32, #tpu.memory_space<smem>>
    %154 = vector.broadcast %153 : f32 to vector<16x50xf32>
    %155 = arith.mulf %154, %140 : vector<16x50xf32>
    %156 = arith.addf %126, %155 : vector<16x50xf32>
    %c25_65 = arith.constant 25 : index
    %157 = memref.load %arg2[%c25_65] : memref<98xf32, #tpu.memory_space<smem>>
    %158 = vector.broadcast %157 : f32 to vector<16x50xf32>
    %159 = arith.mulf %158, %140 : vector<16x50xf32>
    %160 = arith.addf %130, %159 : vector<16x50xf32>
    %c26 = arith.constant 26 : index
    %161 = memref.load %arg2[%c26] : memref<98xf32, #tpu.memory_space<smem>>
    %162 = vector.broadcast %161 : f32 to vector<16x50xf32>
    %163 = arith.mulf %162, %140 : vector<16x50xf32>
    %164 = arith.addf %134, %163 : vector<16x50xf32>
    %c27 = arith.constant 27 : index
    %165 = memref.load %arg2[%c27] : memref<98xf32, #tpu.memory_space<smem>>
    %166 = vector.broadcast %165 : f32 to vector<16x50xf32>
    %167 = arith.mulf %166, %140 : vector<16x50xf32>
    %168 = arith.addf %138, %167 : vector<16x50xf32>
    %c0_66 = arith.constant 0 : index
    %c4_67 = arith.constant 4 : index
    %c0_68 = arith.constant 0 : index
    %169 = vector.load %arg4[%c0_66, %c4_67, %c0_68] : memref<2x22x50xf32, #tpu.memory_space<vmem>>, vector<1x16x50xf32>
    %170 = vector.shape_cast %169 : vector<1x16x50xf32> to vector<16x50xf32>
    %c28 = arith.constant 28 : index
    %171 = memref.load %arg2[%c28] : memref<98xf32, #tpu.memory_space<smem>>
    %172 = vector.broadcast %171 : f32 to vector<16x50xf32>
    %173 = arith.mulf %172, %170 : vector<16x50xf32>
    %174 = arith.addf %144, %173 : vector<16x50xf32>
    %c29 = arith.constant 29 : index
    %175 = memref.load %arg2[%c29] : memref<98xf32, #tpu.memory_space<smem>>
    %176 = vector.broadcast %175 : f32 to vector<16x50xf32>
    %177 = arith.mulf %176, %170 : vector<16x50xf32>
    %178 = arith.addf %148, %177 : vector<16x50xf32>
    %c30 = arith.constant 30 : index
    %179 = memref.load %arg2[%c30] : memref<98xf32, #tpu.memory_space<smem>>
    %180 = vector.broadcast %179 : f32 to vector<16x50xf32>
    %181 = arith.mulf %180, %170 : vector<16x50xf32>
    %182 = arith.addf %152, %181 : vector<16x50xf32>
    %c31 = arith.constant 31 : index
    %183 = memref.load %arg2[%c31] : memref<98xf32, #tpu.memory_space<smem>>
    %184 = vector.broadcast %183 : f32 to vector<16x50xf32>
    %185 = arith.mulf %184, %170 : vector<16x50xf32>
    %186 = arith.addf %156, %185 : vector<16x50xf32>
    %c32 = arith.constant 32 : index
    %187 = memref.load %arg2[%c32] : memref<98xf32, #tpu.memory_space<smem>>
    %188 = vector.broadcast %187 : f32 to vector<16x50xf32>
    %189 = arith.mulf %188, %170 : vector<16x50xf32>
    %190 = arith.addf %160, %189 : vector<16x50xf32>
    %c33 = arith.constant 33 : index
    %191 = memref.load %arg2[%c33] : memref<98xf32, #tpu.memory_space<smem>>
    %192 = vector.broadcast %191 : f32 to vector<16x50xf32>
    %193 = arith.mulf %192, %170 : vector<16x50xf32>
    %194 = arith.addf %164, %193 : vector<16x50xf32>
    %c34 = arith.constant 34 : index
    %195 = memref.load %arg2[%c34] : memref<98xf32, #tpu.memory_space<smem>>
    %196 = vector.broadcast %195 : f32 to vector<16x50xf32>
    %197 = arith.mulf %196, %170 : vector<16x50xf32>
    %198 = arith.addf %168, %197 : vector<16x50xf32>
    %c0_69 = arith.constant 0 : index
    %c5_70 = arith.constant 5 : index
    %c0_71 = arith.constant 0 : index
    %199 = vector.load %arg4[%c0_69, %c5_70, %c0_71] : memref<2x22x50xf32, #tpu.memory_space<vmem>>, vector<1x16x50xf32>
    %200 = vector.shape_cast %199 : vector<1x16x50xf32> to vector<16x50xf32>
    %c35 = arith.constant 35 : index
    %201 = memref.load %arg2[%c35] : memref<98xf32, #tpu.memory_space<smem>>
    %202 = vector.broadcast %201 : f32 to vector<16x50xf32>
    %203 = arith.mulf %202, %200 : vector<16x50xf32>
    %204 = arith.addf %174, %203 : vector<16x50xf32>
    %c36 = arith.constant 36 : index
    %205 = memref.load %arg2[%c36] : memref<98xf32, #tpu.memory_space<smem>>
    %206 = vector.broadcast %205 : f32 to vector<16x50xf32>
    %207 = arith.mulf %206, %200 : vector<16x50xf32>
    %208 = arith.addf %178, %207 : vector<16x50xf32>
    %c37 = arith.constant 37 : index
    %209 = memref.load %arg2[%c37] : memref<98xf32, #tpu.memory_space<smem>>
    %210 = vector.broadcast %209 : f32 to vector<16x50xf32>
    %211 = arith.mulf %210, %200 : vector<16x50xf32>
    %212 = arith.addf %182, %211 : vector<16x50xf32>
    %c38 = arith.constant 38 : index
    %213 = memref.load %arg2[%c38] : memref<98xf32, #tpu.memory_space<smem>>
    %214 = vector.broadcast %213 : f32 to vector<16x50xf32>
    %215 = arith.mulf %214, %200 : vector<16x50xf32>
    %216 = arith.addf %186, %215 : vector<16x50xf32>
    %c39 = arith.constant 39 : index
    %217 = memref.load %arg2[%c39] : memref<98xf32, #tpu.memory_space<smem>>
    %218 = vector.broadcast %217 : f32 to vector<16x50xf32>
    %219 = arith.mulf %218, %200 : vector<16x50xf32>
    %220 = arith.addf %190, %219 : vector<16x50xf32>
    %c40 = arith.constant 40 : index
    %221 = memref.load %arg2[%c40] : memref<98xf32, #tpu.memory_space<smem>>
    %222 = vector.broadcast %221 : f32 to vector<16x50xf32>
    %223 = arith.mulf %222, %200 : vector<16x50xf32>
    %224 = arith.addf %194, %223 : vector<16x50xf32>
    %c41 = arith.constant 41 : index
    %225 = memref.load %arg2[%c41] : memref<98xf32, #tpu.memory_space<smem>>
    %226 = vector.broadcast %225 : f32 to vector<16x50xf32>
    %227 = arith.mulf %226, %200 : vector<16x50xf32>
    %228 = arith.addf %198, %227 : vector<16x50xf32>
    %c0_72 = arith.constant 0 : index
    %c6_73 = arith.constant 6 : index
    %c0_74 = arith.constant 0 : index
    %229 = vector.load %arg4[%c0_72, %c6_73, %c0_74] : memref<2x22x50xf32, #tpu.memory_space<vmem>>, vector<1x16x50xf32>
    %230 = vector.shape_cast %229 : vector<1x16x50xf32> to vector<16x50xf32>
    %c42 = arith.constant 42 : index
    %231 = memref.load %arg2[%c42] : memref<98xf32, #tpu.memory_space<smem>>
    %232 = vector.broadcast %231 : f32 to vector<16x50xf32>
    %233 = arith.mulf %232, %230 : vector<16x50xf32>
    %234 = arith.addf %204, %233 : vector<16x50xf32>
    %c43 = arith.constant 43 : index
    %235 = memref.load %arg2[%c43] : memref<98xf32, #tpu.memory_space<smem>>
    %236 = vector.broadcast %235 : f32 to vector<16x50xf32>
    %237 = arith.mulf %236, %230 : vector<16x50xf32>
    %238 = arith.addf %208, %237 : vector<16x50xf32>
    %c44 = arith.constant 44 : index
    %239 = memref.load %arg2[%c44] : memref<98xf32, #tpu.memory_space<smem>>
    %240 = vector.broadcast %239 : f32 to vector<16x50xf32>
    %241 = arith.mulf %240, %230 : vector<16x50xf32>
    %242 = arith.addf %212, %241 : vector<16x50xf32>
    %c45 = arith.constant 45 : index
    %243 = memref.load %arg2[%c45] : memref<98xf32, #tpu.memory_space<smem>>
    %244 = vector.broadcast %243 : f32 to vector<16x50xf32>
    %245 = arith.mulf %244, %230 : vector<16x50xf32>
    %246 = arith.addf %216, %245 : vector<16x50xf32>
    %c46 = arith.constant 46 : index
    %247 = memref.load %arg2[%c46] : memref<98xf32, #tpu.memory_space<smem>>
    %248 = vector.broadcast %247 : f32 to vector<16x50xf32>
    %249 = arith.mulf %248, %230 : vector<16x50xf32>
    %250 = arith.addf %220, %249 : vector<16x50xf32>
    %c47 = arith.constant 47 : index
    %251 = memref.load %arg2[%c47] : memref<98xf32, #tpu.memory_space<smem>>
    %252 = vector.broadcast %251 : f32 to vector<16x50xf32>
    %253 = arith.mulf %252, %230 : vector<16x50xf32>
    %254 = arith.addf %224, %253 : vector<16x50xf32>
    %c48 = arith.constant 48 : index
    %255 = memref.load %arg2[%c48] : memref<98xf32, #tpu.memory_space<smem>>
    %256 = vector.broadcast %255 : f32 to vector<16x50xf32>
    %257 = arith.mulf %256, %230 : vector<16x50xf32>
    %258 = arith.addf %228, %257 : vector<16x50xf32>
    %c1_75 = arith.constant 1 : index
    %c0_76 = arith.constant 0 : index
    %c0_77 = arith.constant 0 : index
    %259 = vector.load %arg4[%c1_75, %c0_76, %c0_77] : memref<2x22x50xf32, #tpu.memory_space<vmem>>, vector<1x16x50xf32>
    %260 = vector.shape_cast %259 : vector<1x16x50xf32> to vector<16x50xf32>
    %c49 = arith.constant 49 : index
    %261 = memref.load %arg2[%c49] : memref<98xf32, #tpu.memory_space<smem>>
    %262 = vector.broadcast %261 : f32 to vector<16x50xf32>
    %263 = arith.mulf %262, %260 : vector<16x50xf32>
    %264 = arith.addf %234, %263 : vector<16x50xf32>
    %c50 = arith.constant 50 : index
    %265 = memref.load %arg2[%c50] : memref<98xf32, #tpu.memory_space<smem>>
    %266 = vector.broadcast %265 : f32 to vector<16x50xf32>
    %267 = arith.mulf %266, %260 : vector<16x50xf32>
    %268 = arith.addf %238, %267 : vector<16x50xf32>
    %c51 = arith.constant 51 : index
    %269 = memref.load %arg2[%c51] : memref<98xf32, #tpu.memory_space<smem>>
    %270 = vector.broadcast %269 : f32 to vector<16x50xf32>
    %271 = arith.mulf %270, %260 : vector<16x50xf32>
    %272 = arith.addf %242, %271 : vector<16x50xf32>
    %c52 = arith.constant 52 : index
    %273 = memref.load %arg2[%c52] : memref<98xf32, #tpu.memory_space<smem>>
    %274 = vector.broadcast %273 : f32 to vector<16x50xf32>
    %275 = arith.mulf %274, %260 : vector<16x50xf32>
    %276 = arith.addf %246, %275 : vector<16x50xf32>
    %c53 = arith.constant 53 : index
    %277 = memref.load %arg2[%c53] : memref<98xf32, #tpu.memory_space<smem>>
    %278 = vector.broadcast %277 : f32 to vector<16x50xf32>
    %279 = arith.mulf %278, %260 : vector<16x50xf32>
    %280 = arith.addf %250, %279 : vector<16x50xf32>
    %c54 = arith.constant 54 : index
    %281 = memref.load %arg2[%c54] : memref<98xf32, #tpu.memory_space<smem>>
    %282 = vector.broadcast %281 : f32 to vector<16x50xf32>
    %283 = arith.mulf %282, %260 : vector<16x50xf32>
    %284 = arith.addf %254, %283 : vector<16x50xf32>
    %c55 = arith.constant 55 : index
    %285 = memref.load %arg2[%c55] : memref<98xf32, #tpu.memory_space<smem>>
    %286 = vector.broadcast %285 : f32 to vector<16x50xf32>
    %287 = arith.mulf %286, %260 : vector<16x50xf32>
    %288 = arith.addf %258, %287 : vector<16x50xf32>
    %c1_78 = arith.constant 1 : index
    %c1_79 = arith.constant 1 : index
    %c0_80 = arith.constant 0 : index
    %289 = vector.load %arg4[%c1_78, %c1_79, %c0_80] : memref<2x22x50xf32, #tpu.memory_space<vmem>>, vector<1x16x50xf32>
    %290 = vector.shape_cast %289 : vector<1x16x50xf32> to vector<16x50xf32>
    %c56 = arith.constant 56 : index
    %291 = memref.load %arg2[%c56] : memref<98xf32, #tpu.memory_space<smem>>
    %292 = vector.broadcast %291 : f32 to vector<16x50xf32>
    %293 = arith.mulf %292, %290 : vector<16x50xf32>
    %294 = arith.addf %264, %293 : vector<16x50xf32>
    %c57 = arith.constant 57 : index
    %295 = memref.load %arg2[%c57] : memref<98xf32, #tpu.memory_space<smem>>
    %296 = vector.broadcast %295 : f32 to vector<16x50xf32>
    %297 = arith.mulf %296, %290 : vector<16x50xf32>
    %298 = arith.addf %268, %297 : vector<16x50xf32>
    %c58 = arith.constant 58 : index
    %299 = memref.load %arg2[%c58] : memref<98xf32, #tpu.memory_space<smem>>
    %300 = vector.broadcast %299 : f32 to vector<16x50xf32>
    %301 = arith.mulf %300, %290 : vector<16x50xf32>
    %302 = arith.addf %272, %301 : vector<16x50xf32>
    %c59 = arith.constant 59 : index
    %303 = memref.load %arg2[%c59] : memref<98xf32, #tpu.memory_space<smem>>
    %304 = vector.broadcast %303 : f32 to vector<16x50xf32>
    %305 = arith.mulf %304, %290 : vector<16x50xf32>
    %306 = arith.addf %276, %305 : vector<16x50xf32>
    %c60 = arith.constant 60 : index
    %307 = memref.load %arg2[%c60] : memref<98xf32, #tpu.memory_space<smem>>
    %308 = vector.broadcast %307 : f32 to vector<16x50xf32>
    %309 = arith.mulf %308, %290 : vector<16x50xf32>
    %310 = arith.addf %280, %309 : vector<16x50xf32>
    %c61 = arith.constant 61 : index
    %311 = memref.load %arg2[%c61] : memref<98xf32, #tpu.memory_space<smem>>
    %312 = vector.broadcast %311 : f32 to vector<16x50xf32>
    %313 = arith.mulf %312, %290 : vector<16x50xf32>
    %314 = arith.addf %284, %313 : vector<16x50xf32>
    %c62 = arith.constant 62 : index
    %315 = memref.load %arg2[%c62] : memref<98xf32, #tpu.memory_space<smem>>
    %316 = vector.broadcast %315 : f32 to vector<16x50xf32>
    %317 = arith.mulf %316, %290 : vector<16x50xf32>
    %318 = arith.addf %288, %317 : vector<16x50xf32>
    %c1_81 = arith.constant 1 : index
    %c2_82 = arith.constant 2 : index
    %c0_83 = arith.constant 0 : index
    %319 = vector.load %arg4[%c1_81, %c2_82, %c0_83] : memref<2x22x50xf32, #tpu.memory_space<vmem>>, vector<1x16x50xf32>
    %320 = vector.shape_cast %319 : vector<1x16x50xf32> to vector<16x50xf32>
    %c63 = arith.constant 63 : index
    %321 = memref.load %arg2[%c63] : memref<98xf32, #tpu.memory_space<smem>>
    %322 = vector.broadcast %321 : f32 to vector<16x50xf32>
    %323 = arith.mulf %322, %320 : vector<16x50xf32>
    %324 = arith.addf %294, %323 : vector<16x50xf32>
    %c64 = arith.constant 64 : index
    %325 = memref.load %arg2[%c64] : memref<98xf32, #tpu.memory_space<smem>>
    %326 = vector.broadcast %325 : f32 to vector<16x50xf32>
    %327 = arith.mulf %326, %320 : vector<16x50xf32>
    %328 = arith.addf %298, %327 : vector<16x50xf32>
    %c65 = arith.constant 65 : index
    %329 = memref.load %arg2[%c65] : memref<98xf32, #tpu.memory_space<smem>>
    %330 = vector.broadcast %329 : f32 to vector<16x50xf32>
    %331 = arith.mulf %330, %320 : vector<16x50xf32>
    %332 = arith.addf %302, %331 : vector<16x50xf32>
    %c66 = arith.constant 66 : index
    %333 = memref.load %arg2[%c66] : memref<98xf32, #tpu.memory_space<smem>>
    %334 = vector.broadcast %333 : f32 to vector<16x50xf32>
    %335 = arith.mulf %334, %320 : vector<16x50xf32>
    %336 = arith.addf %306, %335 : vector<16x50xf32>
    %c67 = arith.constant 67 : index
    %337 = memref.load %arg2[%c67] : memref<98xf32, #tpu.memory_space<smem>>
    %338 = vector.broadcast %337 : f32 to vector<16x50xf32>
    %339 = arith.mulf %338, %320 : vector<16x50xf32>
    %340 = arith.addf %310, %339 : vector<16x50xf32>
    %c68 = arith.constant 68 : index
    %341 = memref.load %arg2[%c68] : memref<98xf32, #tpu.memory_space<smem>>
    %342 = vector.broadcast %341 : f32 to vector<16x50xf32>
    %343 = arith.mulf %342, %320 : vector<16x50xf32>
    %344 = arith.addf %314, %343 : vector<16x50xf32>
    %c69 = arith.constant 69 : index
    %345 = memref.load %arg2[%c69] : memref<98xf32, #tpu.memory_space<smem>>
    %346 = vector.broadcast %345 : f32 to vector<16x50xf32>
    %347 = arith.mulf %346, %320 : vector<16x50xf32>
    %348 = arith.addf %318, %347 : vector<16x50xf32>
    %c1_84 = arith.constant 1 : index
    %c3_85 = arith.constant 3 : index
    %c0_86 = arith.constant 0 : index
    %349 = vector.load %arg4[%c1_84, %c3_85, %c0_86] : memref<2x22x50xf32, #tpu.memory_space<vmem>>, vector<1x16x50xf32>
    %350 = vector.shape_cast %349 : vector<1x16x50xf32> to vector<16x50xf32>
    %c70 = arith.constant 70 : index
    %351 = memref.load %arg2[%c70] : memref<98xf32, #tpu.memory_space<smem>>
    %352 = vector.broadcast %351 : f32 to vector<16x50xf32>
    %353 = arith.mulf %352, %350 : vector<16x50xf32>
    %354 = arith.addf %324, %353 : vector<16x50xf32>
    %c71 = arith.constant 71 : index
    %355 = memref.load %arg2[%c71] : memref<98xf32, #tpu.memory_space<smem>>
    %356 = vector.broadcast %355 : f32 to vector<16x50xf32>
    %357 = arith.mulf %356, %350 : vector<16x50xf32>
    %358 = arith.addf %328, %357 : vector<16x50xf32>
    %c72 = arith.constant 72 : index
    %359 = memref.load %arg2[%c72] : memref<98xf32, #tpu.memory_space<smem>>
    %360 = vector.broadcast %359 : f32 to vector<16x50xf32>
    %361 = arith.mulf %360, %350 : vector<16x50xf32>
    %362 = arith.addf %332, %361 : vector<16x50xf32>
    %c73 = arith.constant 73 : index
    %363 = memref.load %arg2[%c73] : memref<98xf32, #tpu.memory_space<smem>>
    %364 = vector.broadcast %363 : f32 to vector<16x50xf32>
    %365 = arith.mulf %364, %350 : vector<16x50xf32>
    %366 = arith.addf %336, %365 : vector<16x50xf32>
    %c74 = arith.constant 74 : index
    %367 = memref.load %arg2[%c74] : memref<98xf32, #tpu.memory_space<smem>>
    %368 = vector.broadcast %367 : f32 to vector<16x50xf32>
    %369 = arith.mulf %368, %350 : vector<16x50xf32>
    %370 = arith.addf %340, %369 : vector<16x50xf32>
    %c75 = arith.constant 75 : index
    %371 = memref.load %arg2[%c75] : memref<98xf32, #tpu.memory_space<smem>>
    %372 = vector.broadcast %371 : f32 to vector<16x50xf32>
    %373 = arith.mulf %372, %350 : vector<16x50xf32>
    %374 = arith.addf %344, %373 : vector<16x50xf32>
    %c76 = arith.constant 76 : index
    %375 = memref.load %arg2[%c76] : memref<98xf32, #tpu.memory_space<smem>>
    %376 = vector.broadcast %375 : f32 to vector<16x50xf32>
    %377 = arith.mulf %376, %350 : vector<16x50xf32>
    %378 = arith.addf %348, %377 : vector<16x50xf32>
    %c1_87 = arith.constant 1 : index
    %c4_88 = arith.constant 4 : index
    %c0_89 = arith.constant 0 : index
    %379 = vector.load %arg4[%c1_87, %c4_88, %c0_89] : memref<2x22x50xf32, #tpu.memory_space<vmem>>, vector<1x16x50xf32>
    %380 = vector.shape_cast %379 : vector<1x16x50xf32> to vector<16x50xf32>
    %c77 = arith.constant 77 : index
    %381 = memref.load %arg2[%c77] : memref<98xf32, #tpu.memory_space<smem>>
    %382 = vector.broadcast %381 : f32 to vector<16x50xf32>
    %383 = arith.mulf %382, %380 : vector<16x50xf32>
    %384 = arith.addf %354, %383 : vector<16x50xf32>
    %c78 = arith.constant 78 : index
    %385 = memref.load %arg2[%c78] : memref<98xf32, #tpu.memory_space<smem>>
    %386 = vector.broadcast %385 : f32 to vector<16x50xf32>
    %387 = arith.mulf %386, %380 : vector<16x50xf32>
    %388 = arith.addf %358, %387 : vector<16x50xf32>
    %c79 = arith.constant 79 : index
    %389 = memref.load %arg2[%c79] : memref<98xf32, #tpu.memory_space<smem>>
    %390 = vector.broadcast %389 : f32 to vector<16x50xf32>
    %391 = arith.mulf %390, %380 : vector<16x50xf32>
    %392 = arith.addf %362, %391 : vector<16x50xf32>
    %c80 = arith.constant 80 : index
    %393 = memref.load %arg2[%c80] : memref<98xf32, #tpu.memory_space<smem>>
    %394 = vector.broadcast %393 : f32 to vector<16x50xf32>
    %395 = arith.mulf %394, %380 : vector<16x50xf32>
    %396 = arith.addf %366, %395 : vector<16x50xf32>
    %c81 = arith.constant 81 : index
    %397 = memref.load %arg2[%c81] : memref<98xf32, #tpu.memory_space<smem>>
    %398 = vector.broadcast %397 : f32 to vector<16x50xf32>
    %399 = arith.mulf %398, %380 : vector<16x50xf32>
    %400 = arith.addf %370, %399 : vector<16x50xf32>
    %c82 = arith.constant 82 : index
    %401 = memref.load %arg2[%c82] : memref<98xf32, #tpu.memory_space<smem>>
    %402 = vector.broadcast %401 : f32 to vector<16x50xf32>
    %403 = arith.mulf %402, %380 : vector<16x50xf32>
    %404 = arith.addf %374, %403 : vector<16x50xf32>
    %c83 = arith.constant 83 : index
    %405 = memref.load %arg2[%c83] : memref<98xf32, #tpu.memory_space<smem>>
    %406 = vector.broadcast %405 : f32 to vector<16x50xf32>
    %407 = arith.mulf %406, %380 : vector<16x50xf32>
    %408 = arith.addf %378, %407 : vector<16x50xf32>
    %c1_90 = arith.constant 1 : index
    %c5_91 = arith.constant 5 : index
    %c0_92 = arith.constant 0 : index
    %409 = vector.load %arg4[%c1_90, %c5_91, %c0_92] : memref<2x22x50xf32, #tpu.memory_space<vmem>>, vector<1x16x50xf32>
    %410 = vector.shape_cast %409 : vector<1x16x50xf32> to vector<16x50xf32>
    %c84 = arith.constant 84 : index
    %411 = memref.load %arg2[%c84] : memref<98xf32, #tpu.memory_space<smem>>
    %412 = vector.broadcast %411 : f32 to vector<16x50xf32>
    %413 = arith.mulf %412, %410 : vector<16x50xf32>
    %414 = arith.addf %384, %413 : vector<16x50xf32>
    %c85 = arith.constant 85 : index
    %415 = memref.load %arg2[%c85] : memref<98xf32, #tpu.memory_space<smem>>
    %416 = vector.broadcast %415 : f32 to vector<16x50xf32>
    %417 = arith.mulf %416, %410 : vector<16x50xf32>
    %418 = arith.addf %388, %417 : vector<16x50xf32>
    %c86 = arith.constant 86 : index
    %419 = memref.load %arg2[%c86] : memref<98xf32, #tpu.memory_space<smem>>
    %420 = vector.broadcast %419 : f32 to vector<16x50xf32>
    %421 = arith.mulf %420, %410 : vector<16x50xf32>
    %422 = arith.addf %392, %421 : vector<16x50xf32>
    %c87 = arith.constant 87 : index
    %423 = memref.load %arg2[%c87] : memref<98xf32, #tpu.memory_space<smem>>
    %424 = vector.broadcast %423 : f32 to vector<16x50xf32>
    %425 = arith.mulf %424, %410 : vector<16x50xf32>
    %426 = arith.addf %396, %425 : vector<16x50xf32>
    %c88 = arith.constant 88 : index
    %427 = memref.load %arg2[%c88] : memref<98xf32, #tpu.memory_space<smem>>
    %428 = vector.broadcast %427 : f32 to vector<16x50xf32>
    %429 = arith.mulf %428, %410 : vector<16x50xf32>
    %430 = arith.addf %400, %429 : vector<16x50xf32>
    %c89 = arith.constant 89 : index
    %431 = memref.load %arg2[%c89] : memref<98xf32, #tpu.memory_space<smem>>
    %432 = vector.broadcast %431 : f32 to vector<16x50xf32>
    %433 = arith.mulf %432, %410 : vector<16x50xf32>
    %434 = arith.addf %404, %433 : vector<16x50xf32>
    %c90 = arith.constant 90 : index
    %435 = memref.load %arg2[%c90] : memref<98xf32, #tpu.memory_space<smem>>
    %436 = vector.broadcast %435 : f32 to vector<16x50xf32>
    %437 = arith.mulf %436, %410 : vector<16x50xf32>
    %438 = arith.addf %408, %437 : vector<16x50xf32>
    %c1_93 = arith.constant 1 : index
    %c6_94 = arith.constant 6 : index
    %c0_95 = arith.constant 0 : index
    %439 = vector.load %arg4[%c1_93, %c6_94, %c0_95] : memref<2x22x50xf32, #tpu.memory_space<vmem>>, vector<1x16x50xf32>
    %440 = vector.shape_cast %439 : vector<1x16x50xf32> to vector<16x50xf32>
    %c91 = arith.constant 91 : index
    %441 = memref.load %arg2[%c91] : memref<98xf32, #tpu.memory_space<smem>>
    %442 = vector.broadcast %441 : f32 to vector<16x50xf32>
    %443 = arith.mulf %442, %440 : vector<16x50xf32>
    %444 = arith.addf %414, %443 : vector<16x50xf32>
    %c92 = arith.constant 92 : index
    %445 = memref.load %arg2[%c92] : memref<98xf32, #tpu.memory_space<smem>>
    %446 = vector.broadcast %445 : f32 to vector<16x50xf32>
    %447 = arith.mulf %446, %440 : vector<16x50xf32>
    %448 = arith.addf %418, %447 : vector<16x50xf32>
    %c93 = arith.constant 93 : index
    %449 = memref.load %arg2[%c93] : memref<98xf32, #tpu.memory_space<smem>>
    %450 = vector.broadcast %449 : f32 to vector<16x50xf32>
    %451 = arith.mulf %450, %440 : vector<16x50xf32>
    %452 = arith.addf %422, %451 : vector<16x50xf32>
    %c94 = arith.constant 94 : index
    %453 = memref.load %arg2[%c94] : memref<98xf32, #tpu.memory_space<smem>>
    %454 = vector.broadcast %453 : f32 to vector<16x50xf32>
    %455 = arith.mulf %454, %440 : vector<16x50xf32>
    %456 = arith.addf %426, %455 : vector<16x50xf32>
    %c95 = arith.constant 95 : index
    %457 = memref.load %arg2[%c95] : memref<98xf32, #tpu.memory_space<smem>>
    %458 = vector.broadcast %457 : f32 to vector<16x50xf32>
    %459 = arith.mulf %458, %440 : vector<16x50xf32>
    %460 = arith.addf %430, %459 : vector<16x50xf32>
    %c96 = arith.constant 96 : index
    %461 = memref.load %arg2[%c96] : memref<98xf32, #tpu.memory_space<smem>>
    %462 = vector.broadcast %461 : f32 to vector<16x50xf32>
    %463 = arith.mulf %462, %440 : vector<16x50xf32>
    %464 = arith.addf %434, %463 : vector<16x50xf32>
    %c97 = arith.constant 97 : index
    %465 = memref.load %arg2[%c97] : memref<98xf32, #tpu.memory_space<smem>>
    %466 = vector.broadcast %465 : f32 to vector<16x50xf32>
    %467 = arith.mulf %466, %440 : vector<16x50xf32>
    %468 = arith.addf %438, %467 : vector<16x50xf32>
    %469 = vector.extract_strided_slice %444 {offsets = [0, 0], sizes = [16, 44], strides = [1, 1]} : vector<16x50xf32> to vector<16x44xf32>
    %470 = vector.extract_strided_slice %448 {offsets = [0, 1], sizes = [16, 44], strides = [1, 1]} : vector<16x50xf32> to vector<16x44xf32>
    %471 = arith.addf %469, %470 : vector<16x44xf32>
    %472 = vector.extract_strided_slice %452 {offsets = [0, 2], sizes = [16, 44], strides = [1, 1]} : vector<16x50xf32> to vector<16x44xf32>
    %473 = arith.addf %471, %472 : vector<16x44xf32>
    %474 = vector.extract_strided_slice %456 {offsets = [0, 3], sizes = [16, 44], strides = [1, 1]} : vector<16x50xf32> to vector<16x44xf32>
    %475 = arith.addf %473, %474 : vector<16x44xf32>
    %476 = vector.extract_strided_slice %460 {offsets = [0, 4], sizes = [16, 44], strides = [1, 1]} : vector<16x50xf32> to vector<16x44xf32>
    %477 = arith.addf %475, %476 : vector<16x44xf32>
    %478 = vector.extract_strided_slice %464 {offsets = [0, 5], sizes = [16, 44], strides = [1, 1]} : vector<16x50xf32> to vector<16x44xf32>
    %479 = arith.addf %477, %478 : vector<16x44xf32>
    %480 = vector.extract_strided_slice %468 {offsets = [0, 6], sizes = [16, 44], strides = [1, 1]} : vector<16x50xf32> to vector<16x44xf32>
    %481 = arith.addf %479, %480 : vector<16x44xf32>
    %482 = arith.negf %481 : vector<16x44xf32>
    %483 = math.exp %482 : vector<16x44xf32>
    %cst_96 = arith.constant 1.000000e+00 : f32
    %484 = vector.broadcast %cst_96 : f32 to vector<16x44xf32>
    %485 = arith.addf %484, %483 : vector<16x44xf32>
    %486 = arith.divf %484, %485 : vector<16x44xf32>
    %c0_97 = arith.constant 0 : index
    %c0_98 = arith.constant 0 : index
    %c0_99 = arith.constant 0 : index
    %487 = vector.load %arg3[%c0_97, %c0_98, %c0_99] : memref<1x16x44xf32, #tpu.memory_space<vmem>>, vector<1x16x44xf32>
    %488 = vector.shape_cast %487 : vector<1x16x44xf32> to vector<16x44xf32>
    %489 = vector.shape_cast %486 : vector<16x44xf32> to vector<1x16x44xf32>
    tpu.vector_store %arg3[%c0_97, %c0_98, %c0_99], %489 {strides = array<i32>} : memref<1x16x44xf32, #tpu.memory_space<vmem>>, vector<1x16x44xf32>,
    return
  }
  func.func @transform_0(%arg0: i32) -> (i32, i32, i32, i32) {
    %c0_i32 = arith.constant 0 : i32
    %c0_i32_0 = arith.constant 0 : i32
    %c0_i32_1 = arith.constant 0 : i32
    %c0_i32_2 = arith.constant 0 : i32
    return %arg0, %c0_i32, %c0_i32_0, %c0_i32_1 : i32, i32, i32, i32
  }
  func.func @transform_1(%arg0: i32) -> i32 {
    %c0_i32 = arith.constant 0 : i32
    %c0_i32_0 = arith.constant 0 : i32
    return %c0_i32 : i32
  }
  func.func @transform_2(%arg0: i32) -> (i32, i32, i32) {
    %c0_i32 = arith.constant 0 : i32
    %c0_i32_0 = arith.constant 0 : i32
    %c0_i32_1 = arith.constant 0 : i32
    return %arg0, %c0_i32, %c0_i32_0 : i32, i32, i32
  }
}

</mosaic_0001>

<bundles_post_ra>
// kernel: tpu_custom_call.1
= control target key start
LH: loop header
LB: loop body
LE: loop exit
PB: predicated region body
PF: predicated region fallthrough
CT: control target
= control target key end

     0   :  { %s1928_s0 = inlined_call_operand.hbm [shape: f32[2,4,16,16], index: 0, kind: input, shape index: {}]   ;;  %s1929_s1 = inlined_call_operand.vmem [shape: f32[98], index: 1, kind: input, shape index: {}]   ;;  %s1930_s2 = inlined_call_operand.hbm [shape: f32[1,16,44], index: 2, kind: output, shape index: {}]  }
   0x1   :  { %2053 = sst [smem:[#allocation75_spill]] %s1930_s2 }
   0x2   :  { %7 = vsyncpa [#allocation4], 0 }
   0x3   :  { %8 = vsyncpa [#allocation6], 0 }
   0x4   :  { %9 = vsyncpa [#allocation5], 0  ;;  %s1025_s9 = smov [#allocation3]   ;;  %s28_s13 = sshll.u32 %s1929_s1, 4  ;;  %s29_s13 = int_to_ptr.vmem [resolvable:$true] %s28_s13 }
   0x5   :  { %s15_s10 = sshll.u32 %s1025_s9, 4  ;;  %s16_s10 = int_to_ptr.vmem [resolvable:$true] %s15_s10 }
   0x6   :  { %s975_s14 = scalar_lea.vmem %s16_s10, 2048  ;;  %p980_p1 = scmp.lt.s32.totalorder %s16_s10, %s16_s10 }
   0x7   :  { %p976_p0 = scmp.ne.s32.totalorder %s16_s10, %s975_s14  ;;  %p981_p2 = scmp.lt.s32.totalorder %s975_s14, %s975_s14 }
   0x9   :  { %p982_p3 = por %p981_p2, %p980_p1 }
   0xb   :  { %p983_p4 = pnand %p982_p3, %p976_p0 }
   0xd   :  { %986 = shalt.err (!%p983_p4)
}
   0xe   :  { %s1931_s15 = smov 128   ;;  %s1932_s16 = smov 8  }
   0xf   :  { %21 = dma.hbm_to_vmem [thread:$0]  %s1928_s0, 2048, %s16_s10, [#allocation4], %s1931_s15, %s1931_s15, %s1932_s16  }
  0x10   :  { %s987_s19 = scalar_lea.vmem %s29_s13, 16  ;;  %p992_p6 = scmp.lt.s32.totalorder %s29_s13, %s29_s13 }
  0x11   :  { %p988_p5 = scmp.ne.s32.totalorder %s29_s13, %s987_s19  ;;  %p993_p7 = scmp.lt.s32.totalorder %s987_s19, %s987_s19 }
  0x13   :  { %p994_p8 = por %p993_p7, %p992_p6 }
  0x15   :  { %p995_p9 = pnand %p994_p8, %p988_p5 }
  0x17   :  { %998 = shalt.err (!%p995_p9)
}
  0x18   :  { %s1028_s1 = smov [#allocation7]  }
  0x19   :  { %31 = dma.vmem_to_smem %s29_s13, 16, %s1028_s1, [#allocation6]  }
  0x1a   :  { %1019 = dma.done.wait [#allocation4], 2048  }
  0x1b   :  { %1020 = vsyncadd [#allocation4], 4294965248 }
  0x1c   :  { %1021 = dma.done.wait [#allocation6], 16  }
  0x1d   :  { %1022 = vsyncadd [#allocation6], 4294967280 }
  0x1e   :  { %38 = sfence }
  0x1f   :  { %v47_v0 = vld [vmem:[#allocation3] sm:$0xff]  ;;  %v50_v1 = vld [vmem:[#allocation3 + $0x10] sm:$0xff]  ;;  %vm39_vm0 = vcmask 408576   ;;  %v48_v9 = vld [vmem:[#allocation3 + $0x8] sm:$0xff]  ;;  %v1029_v10 = vmov 0.0   ;;  %vm42_vm1 = vcmask 406528  }
  0x20   :  { %v57_v2 = vld [vmem:[#allocation3 + $0x20] sm:$0xff]  ;;  %v52_v3 = vadd.f32 %v50_v1, %v47_v0  ;;  %v96_v5 = vld [vmem:[#allocation3 + $0x50] sm:$0xff]  ;;  %40 = vst.msk [vmem:[#allocation2] sm:$0xff] %vm39_vm0, %v1029_v10  ;;  %41 = vst.msk [vmem:[#allocation2 + $0x8] sm:$0xff] %vm39_vm0, %v1029_v10  ;;  %v54_v11 = vmax.f32 %v47_v0, %v50_v1  ;;  %s1030_s0 = smov 3   ;;  %s1031_s20 = smov 25  }
  0x21   :  { %v93_v4 = vld [vmem:[#allocation3 + $0x40] sm:$0xff]  ;;  %v64_v6 = vld [vmem:[#allocation3 + $0x30] sm:$0xff]  ;;  %44 = vst.msk [vmem:[#allocation2 + $0x18] sm:$0xff] %vm39_vm0, %v1029_v10  ;;  %45 = vst.msk [vmem:[#allocation2 + $0x20] sm:$0xff] %vm39_vm0, %v1029_v10  ;;  %s1063_s21 = sld [smem:[#allocation7 + $0x1]]  ;;  %vm78_vm2 = vcmask 154648  }
  0x22   :  { %v98_v7 = vadd.f32 %v96_v5, %v93_v4  ;;  %v103_v8 = vld [vmem:[#allocation3 + $0x60] sm:$0xff]  ;;  %v59_v12 = vadd.f32 %v57_v2, %v52_v3  ;;  %v110_v13 = vld [vmem:[#allocation3 + $0x70] sm:$0xff]  ;;  %v51_v14 = vld [vmem:[#allocation3 + $0x18] sm:$0xff]  ;;  %43 = vst.msk [vmem:[#allocation2 + $0x10] sm:$0x3f] %vm42_vm1, %v1029_v10  ;;  %v61_v28 = vmax.f32 %v54_v11, %v57_v2  ;;  %v100_v29 = vmax.f32 %v93_v4, %v96_v5  ;;  %s1065_s22 = sld [smem:[#allocation7 + $0x8]] }
  0x23   :  { %v58_v15 = vld [vmem:[#allocation3 + $0x28] sm:$0xff]  ;;  %46 = vst.msk [vmem:[#allocation2 + $0x28] sm:$0x3f] %vm42_vm1, %v1029_v10  ;;  %v53_v17 = vadd.f32 %v51_v14, %v48_v9  ;;  %v97_v19 = vld [vmem:[#allocation3 + $0x58] sm:$0xff]  ;;  %v55_v21 = vmax.f32 %v48_v9, %v51_v14  ;;  %s1067_s23 = sld [smem:[#allocation7 + $0xf]]  ;;  %vm124_vm3 = vcmask 335048  }
  0x24   :  { %v105_v16 = vadd.f32 %v103_v8, %v98_v7  ;;  %v94_v18 = vld [vmem:[#allocation3 + $0x48] sm:$0xff]  ;;  %v66_v22 = vadd.f32 %v64_v6, %v59_v12  ;;  %v65_v23 = vld [vmem:[#allocation3 + $0x38] sm:$0xff]  ;;  %v68_v35 = vmax.f32 %v61_v28, %v64_v6  ;;  %v107_v36 = vmax.f32 %v100_v29, %v103_v8  ;;  %s1069_s24 = sld [smem:[#allocation7 + $0x16]] }
  0x25   :  { %v104_v20 = vld [vmem:[#allocation3 + $0x68] sm:$0xff]  ;;  %v99_v24 = vadd.f32 %v97_v19, %v94_v18  ;;  %v60_v26 = vadd.f32 %v58_v15, %v53_v17  ;;  %v111_v27 = vld [vmem:[#allocation3 + $0x78] sm:$0xff]  ;;  %v62_v32 = vmax.f32 %v55_v21, %v58_v15  ;;  %v101_v33 = vmax.f32 %v94_v18, %v97_v19  ;;  %s1071_s25 = sld [smem:[#allocation7 + $0x1d]] }
  0x26   :  { %v112_v25 = vadd.f32 %v110_v13, %v105_v16  ;;  %72 = vrot.lane.b32.xlu0 %v66_v22, %s1030_s0  ;;  %v114_v39 = vmax.f32 %v107_v36, %v110_v13  ;;  %s1073_s26 = sld [smem:[#allocation7 + $0x24]]  ;;  %vm825_vm4 = vcmask 359424  }
  0x27   :  { %v106_v30 = vadd.f32 %v104_v20, %v99_v24  ;;  %v67_v31 = vadd.f32 %v65_v23, %v60_v26  ;;  %v69_v37 = vmax.f32 %v62_v32, %v65_v23  ;;  %v108_v38 = vmax.f32 %v101_v33, %v104_v20  ;;  %2054 = sst [smem:[#allocation12_spill]] %s1063_s21 }
  0x28   :  { %118 = vrot.lane.b32.xlu1 %v112_v25, %s1031_s20  ;;  %2055 = sst [smem:[#allocation13_spill]] %s1065_s22  ;;  %v146_v41 = vstv %s1063_s21  ;;  %v190_v42 = vstv %s1065_s22 }
  0x29   :  { %v113_v34 = vadd.f32 %v111_v27, %v106_v30  ;;  %v115_v40 = vmax.f32 %v108_v38, %v111_v27  ;;  %2056 = sst [smem:[#allocation14_spill]] %s1067_s23  ;;  %v234_v43 = vstv %s1067_s23 }
  0x2a   :  { %74 = vrot.lane.b32.xlu0 %v67_v31, %s1030_s0  ;;  %2057 = sst [smem:[#allocation15_spill]] %s1069_s24  ;;  %v278_v44 = vstv %s1069_s24 }
  0x2b   :  { %2058 = sst [smem:[#allocation16_spill]] %s1071_s25  ;;  %v322_v45 = vstv %s1071_s25 }
  0x2c   :  { %120 = vrot.lane.b32.xlu1 %v113_v34, %s1031_s20  ;;  %2059 = sst [smem:[#allocation17_spill]] %s1073_s26  ;;  %v366_v46 = vstv %s1073_s26 }
  0x2d   :  { %s1075_s27 = sld [smem:[#allocation7 + $0x2b]] }
  0x2e   :  { %83 = vrot.lane.b32.xlu0 %v68_v35, %s1030_s0  ;;  %s1077_s28 = sld [smem:[#allocation7 + $0x32]] }
  0x2f   :  { %s1079_s29 = sld [smem:[#allocation7 + $0x2]] }
  0x30   :  { %85 = vrot.lane.b32.xlu1 %v69_v37, %s1030_s0  ;;  %s1081_s30 = sld [smem:[#allocation7 + $0x39]] }
  0x31   :  { %s1083_s3 = sld [smem:[#allocation7 + $0x9]] }
  0x32   :  { %129 = vrot.lane.b32.xlu0 %v114_v39, %s1031_s20  ;;  %s1085_s4 = sld [smem:[#allocation7 + $0x40]] }
  0x33   :  { %2060 = sst [smem:[#allocation18_spill]] %s1075_s27  ;;  %v410_v47 = vstv %s1075_s27 }
  0x34   :  { %131 = vrot.lane.b32.xlu1 %v115_v40, %s1031_s20  ;;  %2061 = sst [smem:[#allocation19_spill]] %s1077_s28  ;;  %v454_v48 = vstv %s1077_s28 }
  0x35   :  { %2062 = sst [smem:[#allocation20_spill]] %s1079_s29  ;;  %v152_v49 = vstv %s1079_s29 }
  0x36   :  { %2063 = sst [smem:[#allocation21_spill]] %s1081_s30  ;;  %v498_v50 = vstv %s1081_s30 }
  0x37   :  { %2064 = sst [smem:[#allocation22_spill]] %s1083_s3  ;;  %v196_v53 = vstv %s1083_s3 }
  0x38   :  { %2065 = sst [smem:[#allocation23_spill]] %s1085_s4  ;;  %v542_v51 = vstv %s1085_s4 }
  0x39   :  { %s1087_s5 = sld [smem:[#allocation7 + $0x47]] }
  0x3a   :  { %s1089_s6 = sld [smem:[#allocation7 + $0x4e]] }
  0x3b   :  { %s1091_s7 = sld [smem:[#allocation7 + $0x55]] }
  0x3c   :  { %s1093_s8 = sld [smem:[#allocation7 + $0x5c]] }
  0x3d   :  { %s1095_s9 = sld [smem:[#allocation7 + $0x10]] }
  0x3e   :  { %s1097_s10 = sld [smem:[#allocation7 + $0x17]] }
  0x3f   :  { %2066 = sst [smem:[#allocation24_spill]] %s1087_s5  ;;  %v586_v52 = vstv %s1087_s5 }
  0x40   :  { %2067 = sst [smem:[#allocation25_spill]] %s1089_s6  ;;  %v630_v54 = vstv %s1089_s6 }
  0x41   :  { %2068 = sst [smem:[#allocation26_spill]] %s1091_s7  ;;  %v674_v55 = vstv %s1091_s7 }
  0x42   :  { %2069 = sst [smem:[#allocation27_spill]] %s1093_s8  ;;  %v718_v56 = vstv %s1093_s8 }
  0x43   :  { %2070 = sst [smem:[#allocation28_spill]] %s1095_s9  ;;  %v240_v57 = vstv %s1095_s9 }
  0x44   :  { %2071 = sst [smem:[#allocation29_spill]] %s1097_s10  ;;  %v284_v58 = vstv %s1097_s10 }
  0x45   :  { %s1099_s11 = sld [smem:[#allocation7 + $0x1e]] }
  0x46   :  { %s1101_s12 = sld [smem:[#allocation7 + $0x25]] }
  0x47   :  { %s1103_s13 = sld [smem:[#allocation7 + $0x2c]] }
  0x48   :  { %s1105_s14 = sld [smem:[#allocation7 + $0x33]] }
  0x49   :  { %s1107_s17 = sld [smem:[#allocation7 + $0x3a]] }
  0x4a   :  { %s1109_s18 = sld [smem:[#allocation7 + $0x41]] }
  0x4b   :  { %2072 = sst [smem:[#allocation30_spill]] %s1099_s11  ;;  %v328_v59 = vstv %s1099_s11 }
  0x4c   :  { %2073 = sst [smem:[#allocation31_spill]] %s1101_s12  ;;  %v372_v60 = vstv %s1101_s12 }
  0x4d   :  { %2074 = sst [smem:[#allocation32_spill]] %s1103_s13 }
  0x4e   :  { %2075 = sst [smem:[#allocation33_spill]] %s1105_s14 }
  0x4f   :  { %2076 = sst [smem:[#allocation34_spill]] %s1107_s17 }
  0x50   :  { %2077 = sst [smem:[#allocation35_spill]] %s1109_s18 }
  0x51   :  { %s1111_s19 = sld [smem:[#allocation7 + $0x48]] }
  0x52   :  { %s1113_s1 = sld [smem:[#allocation7 + $0x4f]] }
  0x53   :  { %s1115_s0 = sld [smem:[#allocation7 + $0x56]] }
  0x54   :  { %s1117_s20 = sld [smem:[#allocation7 + $0x5d]] }
  0x55   :  { %s1119_s15 = sld [smem:[#allocation7 + $0x3]] }
  0x56   :  { %s1121_s16 = sld [smem:[#allocation7 + $0xa]] }
  0x57   :  { %2078 = sst [smem:[#allocation36_spill]] %s1111_s19 }
  0x58   :  { %2079 = sst [smem:[#allocation37_spill]] %s1113_s1 }
  0x59   :  { %2080 = sst [smem:[#allocation38_spill]] %s1115_s0 }
  0x5a   :  { %2081 = sst [smem:[#allocation39_spill]] %s1117_s20 }
  0x5b   :  { %2082 = sst [smem:[#allocation40_spill]] %s1119_s15 }
  0x5c   :  { %2083 = sst [smem:[#allocation41_spill]] %s1121_s16 }
  0x5d   :  { %s1123_s2 = sld [smem:[#allocation7 + $0x11]] }
  0x5e   :  { %s1125_s13 = sld [smem:[#allocation7 + $0x18]] }
  0x5f   :  { %s1127_s14 = sld [smem:[#allocation7 + $0x1f]] }
  0x60   :  { %s1129_s17 = sld [smem:[#allocation7 + $0x26]] }
  0x61   :  { %s1131_s18 = sld [smem:[#allocation7 + $0x2d]] }
  0x62   :  { %s1133_s19 = sld [smem:[#allocation7 + $0x34]] }
  0x63   :  { %2084 = sst [smem:[#allocation42_spill]] %s1123_s2 }
  0x64   :  { %2085 = sst [smem:[#allocation43_spill]] %s1125_s13 }
  0x65   :  { %2086 = sst [smem:[#allocation44_spill]] %s1127_s14 }
  0x66   :  { %2087 = sst [smem:[#allocation45_spill]] %s1129_s17 }
  0x67   :  { %2088 = sst [smem:[#allocation46_spill]] %s1131_s18 }
  0x68   :  { %2089 = sst [smem:[#allocation47_spill]] %s1133_s19 }
  0x69   :  { %s1135_s1 = sld [smem:[#allocation7 + $0x3b]] }
  0x6a   :  { %s1137_s0 = sld [smem:[#allocation7 + $0x42]] }
  0x6b   :  { %s1139_s20 = sld [smem:[#allocation7 + $0x49]] }
  0x6c   :  { %s1141_s15 = sld [smem:[#allocation7 + $0x50]] }
  0x6d   :  { %s1143_s16 = sld [smem:[#allocation7 + $0x57]] }
  0x6e   :  { %s1145_s2 = sld [smem:[#allocation7 + $0x5e]] }
  0x6f   :  { %2090 = sst [smem:[#allocation48_spill]] %s1135_s1 }
  0x70   :  { %2091 = sst [smem:[#allocation49_spill]] %s1137_s0 }
  0x71   :  { %2092 = sst [smem:[#allocation50_spill]] %s1139_s20 }
  0x72   :  { %2093 = sst [smem:[#allocation51_spill]] %s1141_s15 }
  0x73   :  { %2094 = sst [smem:[#allocation52_spill]] %s1143_s16 }
  0x74   :  { %2095 = sst [smem:[#allocation53_spill]] %s1145_s2 }
  0x75   :  { %s1147_s13 = sld [smem:[#allocation7 + $0x4]] }
  0x76   :  { %s1149_s14 = sld [smem:[#allocation7 + $0xb]] }
  0x77   :  { %s1151_s17 = sld [smem:[#allocation7 + $0x12]] }
  0x78   :  { %s1153_s18 = sld [smem:[#allocation7 + $0x19]] }
  0x79   :  { %s1155_s19 = sld [smem:[#allocation7 + $0x20]] }
  0x7a   :  { %s1157_s0 = sld [smem:[#allocation7 + $0x27]] }
  0x7b   :  { %2096 = sst [smem:[#allocation54_spill]] %s1147_s13 }
  0x7c   :  { %s1159_s20 = sld [smem:[#allocation7 + $0x2e]]  ;;  %v2050_v23 = vstv %s1149_s14 }
  0x7d   :  { %2097 = sst [smem:[#allocation55_spill]] %s1151_s17 }
  0x7e   :  { %2098 = sst [smem:[#allocation56_spill]] %s1153_s18 }
  0x7f   :  { %2099 = sst [smem:[#allocation57_spill]] %s1155_s19 }
  0x80   :  { %2100 = sst [smem:[#allocation58_spill]] %s1157_s0 }
  0x81   :  { %s1161_s15 = sld [smem:[#allocation7 + $0x35]] }
  0x82   :  { %2101 = sst [smem:[#allocation59_spill]] %s1159_s20 }
  0x83   :  { %s1163_s2 = sld [smem:[#allocation7 + $0x3c]] }
  0x84   :  { %s1165_s13 = sld [smem:[#allocation7 + $0x43]] }
  0x85   :  { %s1167_s17 = sld [smem:[#allocation7 + $0x4a]] }
  0x86   :  { %s1169_s18 = sld [smem:[#allocation7 + $0x51]] }
  0x87   :  { %2102 = sst [smem:[#allocation60_spill]] %s1161_s15 }
  0x88   :  { %s1171_s19 = sld [smem:[#allocation7 + $0x58]] }
  0x89   :  { %2103 = sst [smem:[#allocation61_spill]] %s1163_s2 }
  0x8a   :  { %2104 = sst [smem:[#allocation62_spill]] %s1165_s13 }
  0x8b   :  { %2105 = sst [smem:[#allocation63_spill]] %s1167_s17 }
  0x8c   :  { %s1173_s0 = sld [smem:[#allocation7 + $0x5f]] }
  0x8d   :  { %s1175_s20 = sld [smem:[#allocation7 + $0x5]] }
  0x8e   :  { %2106 = sst [smem:[#allocation64_spill]] %s1171_s19 }
  0x8f   :  { %s1177_s15 = sld [smem:[#allocation7 + $0xc]] }
  0x90   :  { %s1179_s2 = sld [smem:[#allocation7 + $0x13]] }
  0x91   :  { %s1181_s13 = sld [smem:[#allocation7 + $0x1a]] }
  0x92   :  { %2107 = sst [smem:[#allocation65_spill]] %s1173_s0 }
  0x93   :  { %s1184_s19 = sld [smem:[#allocation7 + $0x21]] }
  0x94   :  { %s1196_s21 = sld [smem:[#allocation7 + $0x2f]] }
  0x95   :  { %s2115_s22 = sld [smem:[#allocation34_spill]] }
  0x96   :  { %2108 = sst [smem:[#allocation66_spill]] %s1179_s2 }
  0x97   :  { %2109 = sst [smem:[#allocation67_spill]] %s1181_s13 }
  0x98   :  { %s1190_s2 = sld [smem:[#allocation7 + $0x28]]  ;;  %v73_v2 = vpop.permute.xlu0 %72 }
  0x99   :  { %2110 = sst [smem:[#allocation68_spill]] %s1184_s19  ;;  %79 = vst.msk [vmem:[#allocation2 + $0x3] sm:$0xff] %vm78_vm2, %v73_v2 }
  0x9a   :  { %s2112_s13 = sld [smem:[#allocation32_spill]]  ;;  %v119_v7 = vpop.permute.xlu1 %118 }
  0x9b   :  { %2113 = sst [smem:[#allocation70_spill]] %s1196_s21  ;;  %v2051_v63 = vstv %s2115_s22  ;;  %125 = vst.msk [vmem:[#allocation2 + $0x3] sm:$0xff] %vm124_vm3, %v119_v7 }
  0x9c   :  { %s2114_s19 = sld [smem:[#allocation33_spill]]  ;;  %v75_v20 = vpop.permute.xlu0 %74 }
  0x9d   :  { %s2116_s23 = sld [smem:[#allocation35_spill]]  ;;  %80 = vst.msk [vmem:[#allocation2 + $0xb] sm:$0xff] %vm78_vm2, %v75_v20 }
  0x9e   :  { %2111 = sst [smem:[#allocation69_spill]] %s1190_s2  ;;  %v121_v25 = vpop.permute.xlu1 %120 }
  0x9f   :  { %s2117_s24 = sld [smem:[#allocation36_spill]]  ;;  %126 = vst.msk [vmem:[#allocation2 + $0xb] sm:$0xff] %vm124_vm3, %v121_v25 }
  0xa0   :  { %s1202_s25 = sld [smem:[#allocation7 + $0x36]]  ;;  %v416_v61 = vstv %s2112_s13  ;;  %v84_v38 = vpop.permute.xlu0 %83 }
  0xa1   :  { %s2119_s26 = sld [smem:[#allocation37_spill]]  ;;  %90 = vst.msk [vmem:[#allocation2 + $0x1b] sm:$0xff] %vm78_vm2, %v84_v38 }
  0xa2   :  { %s2120_s27 = sld [smem:[#allocation38_spill]]  ;;  %v460_v62 = vstv %s2114_s19  ;;  %v1280_v20 = vld [vmem:[#allocation2] sm:$0xff]  ;;  %v86_v35 = vpop.permute.xlu1 %85 }
  0xa3   :  { %s2122_s29 = sld [smem:[#allocation40_spill]]  ;;  %v2052_v0 = vstv %s2116_s23  ;;  %v1282_v25 = vld [vmem:[#allocation2 + $0x1] sm:$0xff]  ;;  %91 = vst.msk [vmem:[#allocation2 + $0x23] sm:$0xff] %vm78_vm2, %v86_v35  ;;  %v147_v33 = vmul.f32 %v146_v41, %v1280_v20  ;;  %v153_v39 = vmul.f32 %v152_v49, %v1280_v20 }
  0xa4   :  { %s1208_s2 = sld [smem:[#allocation7 + $0x3d]]  ;;  %v1284_v36 = vld [vmem:[#allocation2 + $0x2] sm:$0xff]  ;;  %v191_v38 = vmul.f32 %v190_v42, %v1282_v25  ;;  %v197_v40 = vmul.f32 %v196_v53, %v1282_v25  ;;  %v130_v32 = vpop.permute.xlu0 %129 }
  0xa5   :  { %s2124_s4 = sld [smem:[#allocation41_spill]]  ;;  %v592_v1 = vstv %s2117_s24  ;;  %v1306_v7 = vld [vmem:[#allocation2 + $0x3] sm:$0xff]  ;;  %v235_v34 = vmul.f32 %v234_v43, %v1284_v36  ;;  %135 = vst.msk [vmem:[#allocation2 + $0x1b] sm:$0xff] %vm124_vm3, %v130_v32 }
  0xa6   :  { %2118 = sst [smem:[#allocation71_spill]] %s1202_s25  ;;  %v193_v31 = vadd.f32 %v191_v38, %v147_v33  ;;  %v1321_v29 = vld [vmem:[#allocation2 + $0x8] sm:$0xff]  ;;  %v132_v37 = vpop.permute.xlu1 %131  ;;  %v199_v33 = vadd.f32 %v197_v40, %v153_v39  ;;  %v241_v38 = vmul.f32 %v240_v57, %v1284_v36  ;;  %v279_v32 = vmul.f32 %v278_v44, %v1306_v7 }
  0xa7   :  { %s2125_s5 = sld [smem:[#allocation42_spill]]  ;;  %v636_v3 = vstv %s2119_s26  ;;  %v1323_v28 = vld [vmem:[#allocation2 + $0x9] sm:$0xff]  ;;  %136 = vst.msk [vmem:[#allocation2 + $0x23] sm:$0xff] %vm124_vm3, %v132_v37  ;;  %v148_v39 = vmul.f32 %v146_v41, %v1321_v29 }
  0xa8   :  { %s1214_s30 = sld [smem:[#allocation7 + $0x44]]  ;;  %v680_v4 = vstv %s2120_s27  ;;  %v1325_v35 = vld [vmem:[#allocation2 + $0xa] sm:$0xff]  ;;  %v237_v19 = vadd.f32 %v235_v34, %v193_v31  ;;  %v192_v40 = vmul.f32 %v190_v42, %v1323_v28  ;;  %v243_v27 = vadd.f32 %v241_v38, %v199_v33 }
  0xa9   :  { %s2127_s3 = sld [smem:[#allocation43_spill]]  ;;  %v2049_v6 = vstv %s2122_s29  ;;  %v1333_v30 = vld [vmem:[#allocation2 + $0x4] sm:$0xff]  ;;  %v285_v31 = vmul.f32 %v284_v58, %v1306_v7  ;;  %v236_v26 = vmul.f32 %v234_v43, %v1325_v35  ;;  %v1380_v24 = vld [vmem:[#allocation2 + $0xd] sm:$0xff] }
  0xaa   :  { %2123 = sst [smem:[#allocation72_spill]] %s1208_s2  ;;  %v1345_v21 = vld [vmem:[#allocation2 + $0xb] sm:$0xff]  ;;  %v281_v18 = vadd.f32 %v279_v32, %v237_v19  ;;  %v323_v41 = vmul.f32 %v322_v45, %v1333_v30  ;;  %v194_v42 = vadd.f32 %v192_v40, %v148_v39  ;;  %v329_v38 = vmul.f32 %v328_v59, %v1333_v30 }
  0xab   :  { %s2129_s8 = sld [smem:[#allocation45_spill]]  ;;  %v2048_v8 = vstv %s2124_s4  ;;  %v1347_v2 = vld [vmem:[#allocation2 + $0x5] sm:$0xff]  ;;  %v287_v33 = vadd.f32 %v285_v31, %v243_v27  ;;  %v280_v43 = vmul.f32 %v278_v44, %v1345_v21  ;;  %v1408_v16 = vld [vmem:[#allocation2 + $0xe] sm:$0xff] }
  0xac   :  { %s1220_s7 = sld [smem:[#allocation7 + $0x4b]]  ;;  %v1360_v17 = vld [vmem:[#allocation2 + $0x6] sm:$0xff]  ;;  %v325_v32 = vadd.f32 %v323_v41, %v281_v18  ;;  %v367_v39 = vmul.f32 %v366_v46, %v1347_v2  ;;  %v238_v40 = vadd.f32 %v236_v26, %v194_v42  ;;  %v373_v31 = vmul.f32 %v372_v60, %v1347_v2  ;;  %v1385_v26 = vld [vmem:[#allocation2 + $0x18] sm:$0xff] }
  0xad   :  { %s2131_s9 = sld [smem:[#allocation46_spill]]  ;;  %v2045_v9 = vstv %s2125_s5  ;;  %v1367_v19 = vld [vmem:[#allocation2 + $0xc] sm:$0xff]  ;;  %v331_v27 = vadd.f32 %v329_v38, %v287_v33  ;;  %v411_v41 = vmul.f32 %v410_v47, %v1360_v17  ;;  %v1387_v44 = vld [vmem:[#allocation2 + $0x19] sm:$0xff]  ;;  %v1392_v33 = vmul.f32 %v2049_v6, %v1280_v20 }
  0xae   :  { %2126 = sst [smem:[#allocation73_spill]] %s1214_s30  ;;  %v369_v18 = vadd.f32 %v367_v39, %v325_v32  ;;  %v282_v42 = vadd.f32 %v280_v43, %v238_v40  ;;  %v455_v38 = vmul.f32 %v454_v48, %v1385_v26  ;;  %v1397_v32 = vld [vmem:[#allocation2 + $0x1a] sm:$0xff]  ;;  %v324_v39 = vmul.f32 %v322_v45, %v1367_v19 }
  0xaf   :  { %s1226_s11 = sld [smem:[#allocation7 + $0x52]]  ;;  %v2046_v10 = vstv %s2127_s3  ;;  %v375_v34 = vadd.f32 %v373_v31, %v331_v27  ;;  %v203_v40 = vmul.f32 %v2048_v8, %v1282_v25  ;;  %v499_v37 = vmul.f32 %v498_v50, %v1387_v44  ;;  %v1410_v15 = vld [vmem:[#allocation2 + $0x20] sm:$0xff] }
  0xb0   :  { %s2138_s23 = sld [smem:[#allocation54_spill]]  ;;  %v413_v43 = vadd.f32 %v411_v41, %v369_v18  ;;  %v1415_v14 = vmul.f32 %v2045_v9, %v1284_v36  ;;  %v1420_v45 = vmul.f32 %v2046_v10, %v1306_v7  ;;  %v326_v27 = vadd.f32 %v324_v39, %v282_v42  ;;  %v1436_v13 = vld [vmem:[#allocation2 + $0x1b] sm:$0xff] }
  0xb1   :  { %s1233_s26 = sld [smem:[#allocation7 + $0x59]]  ;;  %v368_v31 = vmul.f32 %v366_v46, %v1380_v24  ;;  %v417_v18 = vmul.f32 %v416_v61, %v1360_v17  ;;  %v543_v10 = vmul.f32 %v542_v51, %v1397_v32  ;;  %v154_v46 = vmul.f32 %v152_v49, %v1321_v29  ;;  %v1450_v6 = vld [vmem:[#allocation2 + $0x1c] sm:$0xff] }
  0xb2   :  { %2130 = sst [smem:[#allocation45_spill]] %s1220_s7  ;;  %v457_v9 = vadd.f32 %v455_v38, %v413_v43  ;;  %v198_v42 = vmul.f32 %v196_v53, %v1323_v28  ;;  %v456_v38 = vmul.f32 %v454_v48, %v1410_v15  ;;  %v1452_v12 = vld [vmem:[#allocation2 + $0x21] sm:$0xff]  ;;  %v461_v49 = vmul.f32 %v460_v62, %v1385_v26 }
  0xb3   :  { %s2141_s27 = sld [smem:[#allocation56_spill]]  ;;  %v370_v39 = vadd.f32 %v368_v31, %v326_v27  ;;  %v419_v43 = vadd.f32 %v417_v18, %v375_v34  ;;  %v505_v53 = vmul.f32 %v2051_v63, %v1387_v44  ;;  %v587_v48 = vmul.f32 %v586_v52, %v1436_v13  ;;  %v1476_v18 = vld [vmem:[#allocation2 + $0x1e] sm:$0xff] }
  0xb4   :  { %s1240_s29 = sld [smem:[#allocation7 + $0x60]]  ;;  %v501_v8 = vadd.f32 %v499_v37, %v457_v9  ;;  %v1468_v9 = vld [vmem:[#allocation2 + $0x1d] sm:$0xff]  ;;  %v242_v37 = vmul.f32 %v240_v57, %v1325_v35  ;;  %v286_v27 = vmul.f32 %v284_v58, %v1345_v21  ;;  %v631_v57 = vmul.f32 %v630_v54, %v1450_v6 }
  0xb5   :  { %2135 = sst [smem:[#allocation46_spill]] %s1226_s11  ;;  %v1480_v63 = vld [vmem:[#allocation2 + $0x23] sm:$0xff]  ;;  %v463_v5 = vadd.f32 %v461_v49, %v419_v43  ;;  %v675_v43 = vmul.f32 %v674_v55, %v1468_v9 }
  0xb6   :  { %s1246_s3 = sld [smem:[#allocation7 + $0x6]]  ;;  %v2047_v22 = vstv %s2138_s23  ;;  %v545_v31 = vadd.f32 %v543_v10, %v501_v8  ;;  %v500_v8 = vmul.f32 %v498_v50, %v1452_v12  ;;  %v330_v10 = vmul.f32 %v328_v59, %v1367_v19  ;;  %v1497_v49 = vld [vmem:[#allocation2 + $0x24] sm:$0xff] }
  0xb7   :  { %2139 = sst [smem:[#allocation54_spill]] %s1233_s26  ;;  %v1431_v41 = vmul.f32 %v2047_v22, %v1280_v20  ;;  %v412_v22 = vmul.f32 %v410_v47, %v1408_v16  ;;  %v1463_v47 = vmul.f32 %v2050_v23, %v1282_v25  ;;  %v1478_v23 = vld [vmem:[#allocation2 + $0x22] sm:$0xff]  ;;  %v588_v59 = vmul.f32 %v586_v52, %v1480_v63 }
  0xb8   :  { %s2147_s10 = sld [smem:[#allocation61_spill]]  ;;  %v589_v11 = vadd.f32 %v587_v48, %v545_v31  ;;  %v544_v50 = vmul.f32 %v542_v51, %v1478_v23  ;;  %v593_v31 = vmul.f32 %v592_v1, %v1436_v13  ;;  %v205_v51 = vadd.f32 %v203_v40, %v1392_v33  ;;  %v1518_v52 = vld [vmem:[#allocation2 + $0x25] sm:$0xff] }
  0xb9   :  { %s1252_s2 = sld [smem:[#allocation7 + $0xd]]  ;;  %v414_v34 = vadd.f32 %v412_v22, %v370_v39  ;;  %v549_v22 = vmul.f32 %v2052_v0, %v1397_v32  ;;  %v200_v39 = vadd.f32 %v198_v42, %v154_v46  ;;  %v507_v46 = vadd.f32 %v505_v53, %v463_v5 }
  0xba   :  { %2143 = sst [smem:[#allocation56_spill]] %s1240_s29  ;;  %v719_v0 = vmul.f32 %v718_v56, %v1476_v18  ;;  %v633_v48 = vadd.f32 %v631_v57, %v589_v11  ;;  %v418_v33 = vmul.f32 %v416_v61, %v1408_v16  ;;  %v249_v40 = vadd.f32 %v1415_v14, %v205_v51 }
  0xbb   :  { %s2151_s16 = sld [smem:[#allocation66_spill]]  ;;  %v458_v58 = vadd.f32 %v456_v38, %v414_v34  ;;  %v244_v42 = vadd.f32 %v242_v37, %v200_v39  ;;  %v551_v34 = vadd.f32 %v549_v22, %v507_v46  ;;  %v632_v37 = vmul.f32 %v630_v54, %v1497_v49 }
  0xbc   :  { %s1259_s19 = sld [smem:[#allocation7 + $0x14]]  ;;  %v637_v39 = vmul.f32 %v636_v3, %v1450_v6  ;;  %v681_v54 = vmul.f32 %v680_v4, %v1468_v9  ;;  %v462_v46 = vmul.f32 %v460_v62, %v1410_v15  ;;  %v293_v61 = vadd.f32 %v1420_v45, %v249_v40 }
  0xbd   :  { %s1266_s28 = sld [smem:[#allocation7 + $0x1b]]  ;;  %v502_v38 = vadd.f32 %v500_v8, %v458_v58  ;;  %v288_v5 = vadd.f32 %v286_v27, %v244_v42  ;;  %v677_v58 = vadd.f32 %v675_v43, %v633_v48  ;;  %v595_v11 = vadd.f32 %v593_v31, %v551_v34  ;;  %v1523_v8 = vld [vmem:[#allocation2 + $0x26] sm:$0xff] }
  0xbe   :  { %s2156_s13 = sld [smem:[#allocation69_spill]]  ;;  %v374_v27 = vmul.f32 %v372_v60, %v1380_v24  ;;  %v2200_v45 = vstv %s2129_s8 }
  0xbf   :  { %2150 = sst [smem:[#allocation61_spill]] %s1252_s2  ;;  %v546_v53 = vadd.f32 %v544_v50, %v502_v38  ;;  %v332_v22 = vadd.f32 %v330_v10, %v288_v5  ;;  %v721_v43 = vadd.f32 %v719_v0, %v677_v58  ;;  %v639_v10 = vadd.f32 %v637_v39, %v595_v11 }
  0xc0   :  { %s1272_s4 = sld [smem:[#allocation7 + $0x22]]  ;;  %v676_v38 = vmul.f32 %v674_v55, %v1518_v52  ;;  %v720_v0 = vmul.f32 %v718_v56, %v1523_v8  ;;  %v379_v5 = vmul.f32 %v2200_v45, %v1347_v2 }
  0xc1   :  { %s1278_s17 = sld [smem:[#allocation7 + $0x29]]  ;;  %v590_v57 = vadd.f32 %v588_v59, %v546_v53  ;;  %v376_v60 = vadd.f32 %v374_v27, %v332_v22  ;;  %v683_v59 = vadd.f32 %v681_v54, %v639_v10  ;;  %v2205_v54 = vstv %s2131_s9 }
  0xc2   :  { %2153 = sst [smem:[#allocation66_spill]] %s1259_s19  ;;  %s1032_s19 = smov 127  }
  0xc3   :  { %2155 = sst [smem:[#allocation74_spill]] %s1266_s28  ;;  %v634_v42 = vadd.f32 %v632_v37, %v590_v57  ;;  %755 = vrot.lane.b32.xlu0 %v721_v43, %s1032_s19  ;;  %v420_v34 = vadd.f32 %v418_v33, %v376_v60  ;;  %v423_v33 = vmul.f32 %v2205_v54, %v1360_v17 }
  0xc4   :  { %s1291_s24 = sld [smem:[#allocation7 + $0x30]] }
  0xc5   :  { %s1304_s21 = sld [smem:[#allocation7 + $0x37]]  ;;  %v678_v55 = vadd.f32 %v676_v38, %v634_v42  ;;  %v464_v51 = vadd.f32 %v462_v46, %v420_v34  ;;  %v638_v34 = vmul.f32 %v636_v3, %v1497_v49 }
  0xc6   :  { %2158 = sst [smem:[#allocation69_spill]] %s1272_s4 }
  0xc7   :  { %2162 = sst [smem:[#allocation12_spill]] %s1278_s17  ;;  %v722_v27 = vadd.f32 %v720_v0, %v678_v55 }
  0xc8   :  { %s1314_s25 = sld [smem:[#allocation7 + $0x3e]] }
  0xc9   :  { %s2177_s6 = sld [smem:[#allocation40_spill]]  ;;  %757 = vrot.lane.b32.xlu1 %v722_v27, %s1032_s19  ;;  %s1035_s19 = smov 124  }
  0xca   :  { %2166 = sst [smem:[#allocation13_spill]] %s1291_s24 }
  0xcb   :  { %2167 = sst [smem:[#allocation20_spill]] %s1304_s21 }
  0xcc   :  { %s2179_s12 = sld [smem:[#allocation41_spill]] }
  0xcd   :  { %s2181_s24 = sld [smem:[#allocation42_spill]] }
  0xce   :  { %2169 = sst [smem:[#allocation22_spill]] %s1314_s25 }
  0xcf   :  { %s2182_s28 = sld [smem:[#allocation43_spill]]  ;;  %v2201_v53 = vstv %s2177_s6  ;;  %s1033_s6 = smov 126  }
  0xd0   :  { %s2186_s21 = sld [smem:[#allocation34_spill]]  ;;  %v160_v37 = vmul.f32 %v2201_v53, %v1321_v29 }
  0xd1   :  { %s2188_s7 = sld [smem:[#allocation35_spill]] }
  0xd2   :  { %s2195_s2 = sld [smem:[#allocation44_spill]]  ;;  %v2204_v11 = vstv %s2179_s12 }
  0xd3   :  { %s2196_s25 = sld [smem:[#allocation39_spill]]  ;;  %v204_v22 = vmul.f32 %v2204_v11, %v1323_v28  ;;  %v2209_v38 = vstv %s2181_s24 }
  0xd4   :  { %s1532_s17 = sld [smem:[#allocation7 + $0x45]] }
  0xd5   :  { %s2198_s22 = sld [smem:[#allocation47_spill]]  ;;  %v206_v42 = vadd.f32 %v204_v22, %v160_v37 }
  0xd6   :  { %v2202_v56 = vstv %s2186_s21  ;;  %s2203_s30 = sld [smem:[#allocation48_spill]] }
  0xd7   :  { %v506_v58 = vmul.f32 %v2202_v56, %v1452_v12  ;;  %s2207_s21 = sld [smem:[#allocation49_spill]]  ;;  %v2208_v60 = vstv %s2188_s7 }
  0xd8   :  { %v2197_v14 = vstv %s2195_s2  ;;  %v550_v46 = vmul.f32 %v2208_v60, %v1478_v23  ;;  %s2210_s12 = sld [smem:[#allocation55_spill]]  ;;  %v2216_v56 = vstv %s2195_s2  ;;  %v2224_v60 = vstv %s2141_s27 }
  0xd9   :  { %v335_v50 = vmul.f32 %v2197_v14, %v1333_v30  ;;  %v2199_v62 = vstv %s2196_s25  ;;  %v508_v10 = vadd.f32 %v506_v58, %v464_v51  ;;  %v594_v14 = vmul.f32 %v592_v1, %v1480_v63  ;;  %s2212_s11 = sld [smem:[#allocation50_spill]] }
  0xda   :  { %v725_v48 = vmul.f32 %v2199_v62, %v1476_v18  ;;  %v572_v62 = vstv %s1532_s17  ;;  %v682_v1 = vmul.f32 %v680_v4, %v1518_v52  ;;  %s2215_s24 = sld [smem:[#allocation51_spill]]  ;;  %v336_v58 = vmul.f32 %v2216_v56, %v1367_v19 }
  0xdb   :  { %v337_v31 = vadd.f32 %v335_v50, %v293_v61  ;;  %v2206_v40 = vstv %s2198_s22  ;;  %v248_v61 = vmul.f32 %v2209_v38, %v1325_v35  ;;  %v2218_v4 = vstv %s2196_s25  ;;  %s2221_s7 = sld [smem:[#allocation52_spill]] }
  0xdc   :  { %v727_v39 = vadd.f32 %v725_v48, %v683_v59  ;;  %v467_v43 = vmul.f32 %v2206_v40, %v1385_v26  ;;  %v2211_v0 = vstv %s2203_s30  ;;  %v552_v48 = vadd.f32 %v550_v46, %v508_v10  ;;  %s2223_s26 = sld [smem:[#allocation58_spill]] }
  0xdd   :  { %v381_v57 = vadd.f32 %v379_v5, %v337_v31  ;;  %v511_v59 = vmul.f32 %v2211_v0, %v1387_v44  ;;  %v250_v55 = vadd.f32 %v248_v61, %v206_v42  ;;  %v2213_v31 = vstv %s2182_s28  ;;  %s2219_s28 = sld [smem:[#allocation57_spill]] }
  0xde   :  { %765 = vrot.lane.b32.xlu0 %v727_v39, %s1033_s6  ;;  %v292_v45 = vmul.f32 %v2213_v31, %v1345_v21  ;;  %v2214_v53 = vstv %s2207_s21  ;;  %v211_v39 = vadd.f32 %v1463_v47, %v1431_v41  ;;  %v596_v51 = vadd.f32 %v594_v14, %v552_v48  ;;  %s2229_s4 = sld [smem:[#allocation60_spill]] }
  0xdf   :  { %v425_v50 = vadd.f32 %v423_v33, %v381_v57  ;;  %v555_v37 = vmul.f32 %v2214_v53, %v1397_v32  ;;  %v2217_v11 = vstv %s2210_s12  ;;  %v726_v27 = vmul.f32 %v2218_v4, %v1523_v8  ;;  %s2253_s0 = sld [smem:[#allocation64_spill]] }
  0xe0   :  { %v294_v3 = vadd.f32 %v292_v45, %v250_v55  ;;  %v253_v22 = vmul.f32 %v2217_v11, %v1284_v36  ;;  %v2220_v54 = vstv %s2212_s11  ;;  %v2222_v41 = vstv %s2129_s8  ;;  %s2228_s8 = sld [smem:[#allocation59_spill]] }
  0xe1   :  { %v469_v5 = vadd.f32 %v467_v43, %v425_v50  ;;  %v599_v33 = vmul.f32 %v2220_v54, %v1436_v13  ;;  %v380_v47 = vmul.f32 %v2222_v41, %v1380_v24  ;;  %v640_v40 = vadd.f32 %v638_v34, %v596_v51  ;;  %s2255_s5 = sld [smem:[#allocation67_spill]] }
  0xe2   :  { %v338_v43 = vadd.f32 %v336_v58, %v294_v3  ;;  %v255_v10 = vadd.f32 %v253_v22, %v211_v39  ;;  %v297_v46 = vmul.f32 %v2224_v60, %v1306_v7  ;;  %v2225_v38 = vstv %s2215_s24  ;;  %s2257_s1 = sld [smem:[#allocation65_spill]] }
  0xe3   :  { %v513_v57 = vadd.f32 %v511_v59, %v469_v5  ;;  %v643_v61 = vmul.f32 %v2225_v38, %v1450_v6  ;;  %v2226_v14 = vstv %s2131_s9  ;;  %v2227_v0 = vstv %s2198_s22  ;;  %s2234_s9 = sld [smem:[#allocation53_spill]] }
  0xe4   :  { %v424_v50 = vmul.f32 %v2226_v14, %v1408_v16  ;;  %v468_v59 = vmul.f32 %v2227_v0, %v1410_v15  ;;  %v684_v48 = vadd.f32 %v682_v1, %v640_v40  ;;  %v382_v34 = vadd.f32 %v380_v47, %v338_v43  ;;  %s2260_s29 = sld [smem:[#allocation68_spill]] }
  0xe5   :  { %v557_v42 = vadd.f32 %v555_v37, %v513_v57  ;;  %v299_v55 = vadd.f32 %v297_v46, %v255_v10  ;;  %v2230_v31 = vstv %s2219_s28  ;;  %v2231_v53 = vstv %s2221_s7  ;;  %s2268_s2 = sld [smem:[#allocation70_spill]] }
  0xe6   :  { %v341_v45 = vmul.f32 %v2230_v31, %v1333_v30  ;;  %v687_v37 = vmul.f32 %v2231_v53, %v1468_v9  ;;  %v2232_v39 = vstv %s2223_s26  ;;  %v2233_v3 = vstv %s2138_s23  ;;  %s2239_s23 = sld [smem:[#allocation62_spill]] }
  0xe7   :  { %v601_v5 = vadd.f32 %v599_v33, %v557_v42  ;;  %v385_v51 = vmul.f32 %v2232_v39, %v1347_v2  ;;  %v166_v56 = vmul.f32 %v2233_v3, %v1321_v29  ;;  %v728_v58 = vadd.f32 %v726_v27, %v684_v48  ;;  %s2271_s25 = sld [smem:[#allocation71_spill]] }
  0xe8   :  { %v426_v1 = vadd.f32 %v424_v50, %v382_v34  ;;  %v343_v11 = vadd.f32 %v341_v45, %v299_v55  ;;  %v2235_v22 = vstv %s1149_s14  ;;  %v2236_v54 = vstv %s2203_s30  ;;  %s2248_s14 = sld [smem:[#allocation63_spill]] }
  0xe9   :  { %v210_v4 = vmul.f32 %v2235_v22, %v1323_v28  ;;  %v645_v57 = vadd.f32 %v643_v61, %v601_v5  ;;  %v512_v33 = vmul.f32 %v2236_v54, %v1452_v12  ;;  %v2237_v41 = vstv %s2228_s8  ;;  %767 = vrot.lane.b32.xlu1 %v728_v58, %s1033_s6  ;;  %s2291_s22 = sld [smem:[#allocation74_spill]] }
  0xea   :  { %v429_v47 = vmul.f32 %v2237_v41, %v1360_v17  ;;  %v2238_v40 = vstv %s2229_s4  ;;  %v470_v27 = vadd.f32 %v468_v59, %v426_v1  ;;  %v387_v10 = vadd.f32 %v385_v51, %v343_v11  ;;  %s2293_s30 = sld [smem:[#allocation46_spill]] }
  0xeb   :  { %v473_v43 = vmul.f32 %v2238_v40, %v1385_v26  ;;  %v212_v60 = vadd.f32 %v210_v4, %v166_v56  ;;  %v2240_v46 = vstv %s2210_s12  ;;  %v689_v38 = vadd.f32 %v687_v37, %v645_v57  ;;  %s2295_s6 = sld [smem:[#allocation54_spill]] }
  0xec   :  { %v254_v42 = vmul.f32 %v2240_v46, %v1325_v35  ;;  %v2241_v61 = vstv %s2234_s9  ;;  %v2242_v50 = vstv %s2207_s21  ;;  %v2243_v48 = vstv %s2147_s10  ;;  %s2298_s21 = sld [smem:[#allocation69_spill]]  ;;  %s1037_s9 = smov 122  }
  0xed   :  { %v731_v14 = vmul.f32 %v2241_v61, %v1476_v18  ;;  %v556_v0 = vmul.f32 %v2242_v50, %v1478_v23  ;;  %v517_v34 = vmul.f32 %v2243_v48, %v1387_v44  ;;  %v514_v55 = vadd.f32 %v512_v33, %v470_v27  ;;  %s2306_s12 = sld [smem:[#allocation12_spill]] }
  0xee   :  { %v431_v59 = vadd.f32 %v429_v47, %v387_v10  ;;  %v256_v31 = vadd.f32 %v254_v42, %v212_v60  ;;  %v2244_v45 = vstv %s2141_s27  ;;  %v2245_v37 = vstv %s2212_s11  ;;  %s1034_s27 = smov 125   ;;  %s1804_s11 = sld [smem:[#allocation7 + $0x4c]] }
  0xef   :  { %v298_v5 = vmul.f32 %v2244_v45, %v1345_v21  ;;  %v733_v53 = vadd.f32 %v731_v14, %v689_v38  ;;  %v600_v39 = vmul.f32 %v2245_v37, %v1480_v63  ;;  %v2246_v51 = vstv %s2215_s24  ;;  %s2309_s24 = sld [smem:[#allocation13_spill]] }
  0xf0   :  { %v644_v3 = vmul.f32 %v2246_v51, %v1497_v49  ;;  %v2247_v56 = vstv %s2239_s23  ;;  %v558_v1 = vadd.f32 %v556_v0, %v514_v55  ;;  %v475_v11 = vadd.f32 %v473_v43, %v431_v59  ;;  %s139_s17 = sld [smem:[#allocation7]] }
  0xf1   :  { %v561_v58 = vmul.f32 %v2247_v56, %v1397_v32  ;;  %v300_v22 = vadd.f32 %v298_v5, %v256_v31  ;;  %v2249_v4 = vstv %s2219_s28  ;;  %775 = vrot.lane.b32.xlu0 %v733_v53, %s1034_s27  ;;  %v2250_v54 = vstv %s2221_s7  ;;  %s2311_s28 = sld [smem:[#allocation20_spill]] }
  0xf2   :  { %v342_v57 = vmul.f32 %v2249_v4, %v1367_v19  ;;  %v688_v33 = vmul.f32 %v2250_v54, %v1518_v52  ;;  %v2251_v41 = vmov %v2241_v61  ;;  %v2252_v40 = vstv %s1175_s20  ;;  %s2316_s7 = sld [smem:[#allocation22_spill]] }
  0xf3   :  { %v732_v47 = vmul.f32 %v2251_v41, %v1523_v8  ;;  %v171_v43 = vmul.f32 %v2252_v40, %v1280_v20  ;;  %v2254_v27 = vstv %s1177_s15  ;;  %v602_v60 = vadd.f32 %v600_v39, %v558_v1 }
  0xf4   :  { %v215_v10 = vmul.f32 %v2254_v27, %v1282_v25  ;;  %v519_v46 = vadd.f32 %v517_v34, %v475_v11  ;;  %v344_v42 = vadd.f32 %v342_v57, %v300_v22  ;;  %v2256_v38 = vstv %s2223_s26  ;;  %s1836_s26 = sld [smem:[#allocation7 + $0x5a]] }
  0xf5   :  { %v386_v61 = vmul.f32 %v2256_v38, %v1380_v24  ;;  %v2258_v14 = vstv %s2248_s14  ;;  %v2259_v0 = vstv %s2228_s8  ;;  %v2261_v59 = vstv %s2151_s16  ;;  %s1847_s8 = sld [smem:[#allocation7 + $0x61]] }
  0xf6   :  { %v605_v50 = vmul.f32 %v2258_v14, %v1436_v13  ;;  %v430_v48 = vmul.f32 %v2259_v0, %v1408_v16  ;;  %v217_v55 = vadd.f32 %v215_v10, %v171_v43  ;;  %v259_v31 = vmul.f32 %v2261_v59, %v1284_v36 }
  0xf7   :  { %v646_v45 = vadd.f32 %v644_v3, %v602_v60  ;;  %v563_v34 = vadd.f32 %v561_v58, %v519_v46  ;;  %v388_v5 = vadd.f32 %v386_v61, %v344_v42  ;;  %v2262_v53 = vstv %s2229_s4  ;;  %s1036_s4 = smov 123  }
  0xf8   :  { %v474_v37 = vmul.f32 %v2262_v53, %v1410_v15  ;;  %v2263_v39 = vstv %s1169_s18  ;;  %v2264_v56 = vstv %s2253_s0  ;;  %v261_v11 = vadd.f32 %v259_v31, %v217_v55 }
  0xf9   :  { %v649_v51 = vmul.f32 %v2263_v39, %v1450_v6  ;;  %v693_v1 = vmul.f32 %v2264_v56, %v1468_v9  ;;  %v2265_v22 = vstv %s2255_s5  ;;  %v690_v57 = vadd.f32 %v688_v33, %v646_v45 }
  0xfa   :  { %v303_v4 = vmul.f32 %v2265_v22, %v1306_v7  ;;  %v607_v3 = vadd.f32 %v605_v50, %v563_v34  ;;  %v2266_v58 = vstv %s2257_s1  ;;  %v432_v41 = vadd.f32 %v430_v48, %v388_v5 }
  0xfb   :  { %v737_v54 = vmul.f32 %v2266_v58, %v1476_v18  ;;  %v2267_v43 = vstv %s2260_s29  ;;  %v2269_v10 = vstv %s1175_s20  ;;  %v2270_v46 = vstv %s1177_s15  ;;  %s2275_s20 = sld [smem:[#allocation72_spill]] }
  0xfc   :  { %v305_v40 = vadd.f32 %v303_v4, %v261_v11  ;;  %v347_v27 = vmul.f32 %v2267_v43, %v1333_v30  ;;  %v172_v60 = vmul.f32 %v2269_v10, %v1321_v29  ;;  %v216_v42 = vmul.f32 %v2270_v46, %v1323_v28  ;;  %s2279_s15 = sld [smem:[#allocation61_spill]] }
  0xfd   :  { %v734_v38 = vadd.f32 %v732_v47, %v690_v57  ;;  %v651_v33 = vadd.f32 %v649_v51, %v607_v3  ;;  %v476_v61 = vadd.f32 %v474_v37, %v432_v41  ;;  %v2272_v14 = vstv %s2147_s10  ;;  %s2285_s10 = sld [smem:[#allocation66_spill]] }
  0xfe   :  { %v518_v50 = vmul.f32 %v2272_v14, %v1452_v12  ;;  %v349_v0 = vadd.f32 %v347_v27, %v305_v40  ;;  %v2273_v48 = vstv %s2156_s13  ;;  %v218_v59 = vadd.f32 %v216_v42, %v172_v60 }
  0xff   :  { %v391_v55 = vmul.f32 %v2273_v48, %v1347_v2  ;;  %v2274_v31 = vstv %s2151_s16  ;;  %777 = vrot.lane.b32.xlu1 %v734_v38, %s1034_s27  ;;  %v695_v47 = vadd.f32 %v693_v1, %v651_v33  ;;  %v2276_v5 = vstv %s2239_s23  ;;  %s2281_s16 = sld [smem:[#allocation73_spill]] }
 0x100   :  { %v260_v45 = vmul.f32 %v2274_v31, %v1325_v35  ;;  %v520_v34 = vadd.f32 %v518_v50, %v476_v61  ;;  %v562_v53 = vmul.f32 %v2276_v5, %v1478_v23  ;;  %v2277_v37 = vstv %s2268_s2  ;;  %s852_s23 = sld [smem:[#allocation7 + $0x7]] }
 0x101   :  { %v435_v39 = vmul.f32 %v2277_v37, %v1360_v17  ;;  %v393_v51 = vadd.f32 %v391_v55, %v349_v0  ;;  %v2278_v56 = vstv %s2271_s25  ;;  %v2280_v4 = vstv %s2255_s5  ;;  %s866_s27 = sld [smem:[#allocation7 + $0x15]] }
 0x102   :  { %v479_v11 = vmul.f32 %v2278_v56, %v1385_v26  ;;  %v262_v22 = vadd.f32 %v260_v45, %v218_v59  ;;  %v304_v57 = vmul.f32 %v2280_v4, %v1345_v21  ;;  %v739_v1 = vadd.f32 %v737_v54, %v695_v47  ;;  %s880_s5 = sld [smem:[#allocation7 + $0x23]] }
 0x103   :  { %v564_v3 = vadd.f32 %v562_v53, %v520_v34  ;;  %v2282_v58 = vstv %s2248_s14  ;;  %v2283_v40 = vstv %s1169_s18  ;;  %v437_v27 = vadd.f32 %v435_v39, %v393_v51  ;;  %s2289_s18 = sld [smem:[#allocation45_spill]] }
 0x104   :  { %v606_v41 = vmul.f32 %v2282_v58, %v1480_v63  ;;  %v650_v43 = vmul.f32 %v2283_v40, %v1497_v49  ;;  %v2284_v10 = vstv %s2275_s20  ;;  %v306_v46 = vadd.f32 %v304_v57, %v262_v22  ;;  %785 = vrot.lane.b32.xlu0 %v739_v1, %s1035_s19  ;;  %s859_s14 = sld [smem:[#allocation7 + $0xe]] }
 0x105   :  { %v523_v60 = vmul.f32 %v2284_v10, %v1387_v44  ;;  %v2286_v42 = vstv %s2260_s29  ;;  %v2287_v33 = vstv %s2253_s0  ;;  %v2288_v14 = vstv %s1246_s3  ;;  %s873_s0 = sld [smem:[#allocation7 + $0x1c]] }
 0x106   :  { %v348_v38 = vmul.f32 %v2286_v42, %v1367_v19  ;;  %v608_v54 = vadd.f32 %v606_v41, %v564_v3  ;;  %v694_v61 = vmul.f32 %v2287_v33, %v1518_v52  ;;  %v177_v50 = vmul.f32 %v2288_v14, %v1280_v20  ;;  %s894_s29 = sld [smem:[#allocation7 + $0x31]] }
 0x107   :  { %v2290_v0 = vstv %s2279_s15  ;;  %v481_v55 = vadd.f32 %v479_v11, %v437_v27  ;;  %v2292_v59 = vstv %s2281_s16  ;;  %v2294_v47 = vstv %s2156_s13  ;;  %s2303_s13 = sld [smem:[#allocation56_spill]] }
 0x108   :  { %v221_v48 = vmul.f32 %v2290_v0, %v1282_v25  ;;  %v567_v31 = vmul.f32 %v2292_v59, %v1397_v32  ;;  %v350_v45 = vadd.f32 %v348_v38, %v306_v46  ;;  %v392_v34 = vmul.f32 %v2294_v47, %v1380_v24 }
 0x109   :  { %v652_v5 = vadd.f32 %v650_v43, %v608_v54  ;;  %v2296_v53 = vstv %s2257_s1  ;;  %v2297_v51 = vstv %s2285_s10  ;;  %v525_v11 = vadd.f32 %v523_v60, %v481_v55  ;;  %s887_s1 = sld [smem:[#allocation7 + $0x2a]] }
 0x10a   :  { %v738_v37 = vmul.f32 %v2296_v53, %v1523_v8  ;;  %v223_v39 = vadd.f32 %v221_v48, %v177_v50  ;;  %v265_v56 = vmul.f32 %v2297_v51, %v1284_v36  ;;  %v394_v22 = vadd.f32 %v392_v34, %v350_v45 }
 0x10b   :  { %v2299_v4 = vstv %s2268_s2  ;;  %v2300_v1 = vstv %s2271_s25  ;;  %v696_v58 = vadd.f32 %v694_v61, %v652_v5  ;;  %v2301_v41 = vstv %s2289_s18  ;;  %s1896_s2 = sld [smem:[#allocation7 + $0x38]] }
 0x10c   :  { %v436_v57 = vmul.f32 %v2299_v4, %v1408_v16  ;;  %v480_v3 = vmul.f32 %v2300_v1, %v1410_v15  ;;  %v611_v40 = vmul.f32 %v2301_v41, %v1436_v13  ;;  %v267_v43 = vadd.f32 %v265_v56, %v223_v39  ;;  %s1900_s25 = sld [smem:[#allocation7 + $0x3f]] }
 0x10d   :  { %v2302_v27 = vstv %s2291_s22  ;;  %v569_v60 = vadd.f32 %v567_v31, %v525_v11  ;;  %v2304_v46 = vstv %s2293_s30  ;;  %v2305_v38 = vstv %s2295_s6 }
 0x10e   :  { %v309_v10 = vmul.f32 %v2302_v27, %v1306_v7  ;;  %v655_v42 = vmul.f32 %v2304_v46, %v1450_v6  ;;  %v699_v54 = vmul.f32 %v2305_v38, %v1468_v9  ;;  %v438_v33 = vadd.f32 %v436_v57, %v394_v22 }
 0x10f   :  { %v740_v61 = vadd.f32 %v738_v37, %v696_v58  ;;  %v2307_v14 = vstv %s2275_s20  ;;  %v2308_v48 = vstv %s2298_s21  ;;  %v613_v59 = vadd.f32 %v611_v40, %v569_v60  ;;  %s915_s20 = sld [smem:[#allocation7 + $0x46]] }
 0x110   :  { %v524_v50 = vmul.f32 %v2307_v14, %v1452_v12  ;;  %v311_v0 = vadd.f32 %v309_v10, %v267_v43  ;;  %v353_v55 = vmul.f32 %v2308_v48, %v1333_v30  ;;  %v482_v31 = vadd.f32 %v480_v3, %v438_v33 }
 0x111   :  { %v2310_v45 = vstv %s1246_s3  ;;  %v2312_v34 = vstv %s2279_s15  ;;  %787 = vrot.lane.b32.xlu1 %v740_v61, %s1035_s19  ;;  %v2313_v53 = vstv %s2303_s13  ;;  %s1822_s3 = sld [smem:[#allocation7 + $0x53]]  ;;  %v657_v4 = vadd.f32 %v655_v42, %v613_v59  ;;  %s1038_s19 = smov [#allocation8]  }
 0x112   :  { %v178_v47 = vmul.f32 %v2310_v45, %v1321_v29  ;;  %v222_v5 = vmul.f32 %v2312_v34, %v1323_v28  ;;  %v743_v37 = vmul.f32 %v2313_v53, %v1476_v18  ;;  %v2314_v39 = vstv %s2281_s16  ;;  %s922_s15 = sld [smem:[#allocation7 + $0x4d]]  ;;  %s833_s18 = sshll.u32 %s1038_s19, 4  ;;  %s834_s18 = int_to_ptr.vmem [resolvable:$true] %s833_s18 }
 0x113   :  { %v568_v51 = vmul.f32 %v2314_v39, %v1478_v23  ;;  %v355_v56 = vadd.f32 %v353_v55, %v311_v0  ;;  %v2315_v11 = vstv %s2306_s12  ;;  %v526_v57 = vadd.f32 %v524_v50, %v482_v31  ;;  %s929_s16 = sld [smem:[#allocation7 + $0x54]]  ;;  %p1004_p11 = scmp.lt.s32.totalorder %s834_s18, %s834_s18 }
 0x114   :  { %v397_v22 = vmul.f32 %v2315_v11, %v1347_v2  ;;  %v224_v1 = vadd.f32 %v222_v5, %v178_v47  ;;  %v2317_v3 = vstv %s2285_s10  ;;  %v612_v40 = vmul.f32 %v2301_v41, %v1480_v63  ;;  %s936_s10 = sld [smem:[#allocation7 + $0x5b]] }
 0x115   :  { %v266_v58 = vmul.f32 %v2317_v3, %v1325_v35  ;;  %v2318_v27 = vstv %s2309_s24  ;;  %v2319_v60 = vstv %s2311_s28  ;;  %v701_v38 = vadd.f32 %v699_v54, %v657_v4 }
 0x116   :  { %v399_v43 = vadd.f32 %v397_v22, %v355_v56  ;;  %v441_v10 = vmul.f32 %v2318_v27, %v1360_v17  ;;  %v485_v46 = vmul.f32 %v2319_v60, %v1385_v26  ;;  %v570_v42 = vadd.f32 %v568_v51, %v526_v57 }
 0x117   :  { %v268_v33 = vadd.f32 %v266_v58, %v224_v1  ;;  %v2320_v61 = vstv %s2291_s22  ;;  %v2321_v50 = vstv %s2293_s30  ;;  %v2322_v55 = vstv %s2316_s7  ;;  %s999_s22 = scalar_lea.vmem %s834_s18, 256 }
 0x118   :  { %v310_v14 = vmul.f32 %v2320_v61, %v1345_v21  ;;  %v656_v0 = vmul.f32 %v2321_v50, %v1497_v49  ;;  %v443_v48 = vadd.f32 %v441_v10, %v399_v43  ;;  %v529_v59 = vmul.f32 %v2322_v55, %v1387_v44  ;;  %p1000_p10 = scmp.ne.s32.totalorder %s834_s18, %s999_s22  ;;  %p1005_p12 = scmp.lt.s32.totalorder %s999_s22, %s999_s22 }
 0x119   :  { %v745_v31 = vadd.f32 %v743_v37, %v701_v38  ;;  %v614_v54 = vadd.f32 %v612_v40, %v570_v42  ;;  %v2323_v47 = vstv %s2298_s21  ;;  %v573_v53 = vmul.f32 %v572_v62, %v1397_v32 }
 0x11a   :  { %v312_v45 = vadd.f32 %v310_v14, %v268_v33  ;;  %v354_v34 = vmul.f32 %v2323_v47, %v1367_v19  ;;  %v487_v5 = vadd.f32 %v485_v46, %v443_v48  ;;  %v616_v39 = vstv %s1804_s11  ;;  %p1006_p13 = por %p1005_p12, %p1004_p11 }
 0x11b   :  { %795 = vrot.lane.b32.xlu0 %v745_v31, %s1036_s4  ;;  %v658_v51 = vadd.f32 %v656_v0, %v614_v54  ;;  %v2324_v37 = vstv %s2295_s6  ;;  %v2325_v22 = vstv %s2306_s12  ;;  %v2326_v57 = vstv %s2303_s13 }
 0x11c   :  { %v700_v56 = vmul.f32 %v2324_v37, %v1518_v52  ;;  %v356_v11 = vadd.f32 %v354_v34, %v312_v45  ;;  %v398_v4 = vmul.f32 %v2325_v22, %v1380_v24  ;;  %v744_v1 = vmul.f32 %v2326_v57, %v1523_v8  ;;  %p1007_p0 = pnand %p1006_p13, %p1000_p10 }
 0x11d   :  { %v531_v3 = vadd.f32 %v529_v59, %v487_v5  ;;  %v660_v58 = vstv %s1822_s3  ;;  %v2327_v43 = vmov %v2318_v27  ;;  %v2328_v10 = vmov %v2319_v60 }
 0x11e   :  { %v702_v41 = vadd.f32 %v700_v56, %v658_v51  ;;  %v400_v40 = vadd.f32 %v398_v4, %v356_v11  ;;  %v442_v27 = vmul.f32 %v2327_v43, %v1408_v16  ;;  %v486_v60 = vmul.f32 %v2328_v10, %v1410_v15 }
 0x11f   :  { %v575_v46 = vadd.f32 %v573_v53, %v531_v3  ;;  %v617_v38 = vmul.f32 %v616_v39, %v1436_v13  ;;  %v704_v33 = vstv %s1836_s26  ;;  %v661_v50 = vmul.f32 %v660_v58, %v1450_v6 }
 0x120   :  { %v746_v42 = vadd.f32 %v744_v1, %v702_v41  ;;  %v444_v61 = vadd.f32 %v442_v27, %v400_v40  ;;  %v748_v0 = vstv %s1847_s8  ;;  %v530_v59 = vmul.f32 %v2322_v55, %v1452_v12 }
 0x121   :  { %v619_v14 = vadd.f32 %v617_v38, %v575_v46  ;;  %v705_v54 = vmul.f32 %v704_v33, %v1468_v9  ;;  %v574_v47 = vmul.f32 %v572_v62, %v1478_v23  ;;  %v749_v5 = vmul.f32 %v748_v0, %v1476_v18 }
 0x122   :  { %797 = vrot.lane.b32.xlu1 %v746_v42, %s1036_s4  ;;  %v488_v48 = vadd.f32 %v486_v60, %v444_v61  ;;  %v618_v51 = vmul.f32 %v616_v39, %v1480_v63  ;;  %v662_v11 = vmul.f32 %v660_v58, %v1497_v49  ;;  %v706_v4 = vmul.f32 %v704_v33, %v1518_v52 }
 0x123   :  { %v663_v31 = vadd.f32 %v661_v50, %v619_v14  ;;  %v750_v1 = vmul.f32 %v748_v0, %v1523_v8  ;;  %v140_v62 = vstv %s139_s17  ;;  %v184_v41 = vstv %s852_s23 }
 0x124   :  { %v532_v45 = vadd.f32 %v530_v59, %v488_v48  ;;  %v185_v39 = vmul.f32 %v184_v41, %v1282_v25  ;;  %v141_v58 = vmul.f32 %v140_v62, %v1280_v20  ;;  %v228_v40 = vstv %s859_s14 }
 0x125   :  { %v707_v34 = vadd.f32 %v705_v54, %v663_v31  ;;  %v229_v27 = vmul.f32 %v228_v40, %v1284_v36  ;;  %v272_v10 = vstv %s866_s27  ;;  %v186_v60 = vmul.f32 %v184_v41, %v1323_v28 }
 0x126   :  { %v576_v53 = vadd.f32 %v574_v47, %v532_v45  ;;  %v187_v43 = vadd.f32 %v185_v39, %v141_v58  ;;  %v142_v46 = vmul.f32 %v140_v62, %v1321_v29  ;;  %v273_v42 = vmul.f32 %v272_v10, %v1306_v7 }
 0x127   :  { %v751_v37 = vadd.f32 %v749_v5, %v707_v34  ;;  %v316_v33 = vstv %s873_s0  ;;  %v230_v20 = vmul.f32 %v228_v40, %v1325_v35  ;;  %v360_v50 = vstv %s880_s5 }
 0x128   :  { %v620_v56 = vadd.f32 %v618_v51, %v576_v53  ;;  %v231_v38 = vadd.f32 %v229_v27, %v187_v43  ;;  %v188_v61 = vadd.f32 %v186_v60, %v142_v46  ;;  %v317_v14 = vmul.f32 %v316_v33, %v1333_v30 }
 0x129   :  { %805 = vrot.lane.b32.xlu0 %v751_v37, %s1037_s9  ;;  %v274_v28 = vmul.f32 %v272_v10, %v1345_v21  ;;  %v361_v29 = vmul.f32 %v360_v50, %v1347_v2  ;;  %v404_v7 = vstv %s887_s1  ;;  %v448_v59 = vstv %s894_s29 }
 0x12a   :  { %v664_v22 = vadd.f32 %v662_v11, %v620_v56  ;;  %v275_v25 = vadd.f32 %v273_v42, %v231_v38  ;;  %v232_v36 = vadd.f32 %v230_v20, %v188_v61  ;;  %v318_v35 = vmul.f32 %v316_v33, %v1367_v19 }
 0x12b   :  { %v405_v30 = vmul.f32 %v404_v7, %v1360_v17  ;;  %v449_v54 = vmul.f32 %v448_v59, %v1385_v26  ;;  %v492_v47 = vstv %s1896_s2  ;;  %v362_v21 = vmul.f32 %v360_v50, %v1380_v24 }
 0x12c   :  { %v708_v57 = vadd.f32 %v706_v4, %v664_v22  ;;  %v319_v0 = vadd.f32 %v317_v14, %v275_v25  ;;  %v276_v48 = vadd.f32 %v274_v28, %v232_v36  ;;  %v493_v34 = vmul.f32 %v492_v47, %v1387_v44 }
 0x12d   :  { %v536_v53 = vstv %s1900_s25  ;;  %v406_v51 = vmul.f32 %v404_v7, %v1408_v16  ;;  %v450_v19 = vmul.f32 %v448_v59, %v1410_v15  ;;  %v580_v11 = vstv %s915_s20 }
 0x12e   :  { %v752_v3 = vadd.f32 %v750_v1, %v708_v57  ;;  %v363_v55 = vadd.f32 %v361_v29, %v319_v0  ;;  %v320_v31 = vadd.f32 %v318_v35, %v276_v48  ;;  %v537_v17 = vmul.f32 %v536_v53, %v1397_v32 }
 0x12f   :  { %v494_v4 = vmul.f32 %v492_v47, %v1452_v12  ;;  %v581_v44 = vmul.f32 %v580_v11, %v1436_v13  ;;  %v624_v57 = vstv %s922_s15  ;;  %v538_v15 = vmul.f32 %v536_v53, %v1478_v23 }
 0x130   :  { %807 = vrot.lane.b32.xlu1 %v752_v3, %s1037_s9  ;;  %v407_v45 = vadd.f32 %v405_v30, %v363_v55  ;;  %v364_v2 = vadd.f32 %v362_v21, %v320_v31  ;;  %v625_v32 = vmul.f32 %v624_v57, %v1450_v6  ;;  %v668_v41 = vstv %s929_s16 }
 0x131   :  { %v582_v40 = vmul.f32 %v580_v11, %v1480_v63  ;;  %v669_v12 = vmul.f32 %v668_v41, %v1468_v9  ;;  %v712_v13 = vstv %s936_s10  ;;  %v626_v46 = vmul.f32 %v624_v57, %v1497_v49 }
 0x132   :  { %v451_v5 = vadd.f32 %v449_v54, %v407_v45  ;;  %v408_v37 = vadd.f32 %v406_v51, %v364_v2  ;;  %v713_v38 = vmul.f32 %v712_v13, %v1476_v18  ;;  %v670_v61 = vmul.f32 %v668_v41, %v1518_v52 }
 0x133   :  { %v714_v14 = vmul.f32 %v712_v13, %v1523_v8 }
 0x134   :  { %v495_v56 = vadd.f32 %v493_v34, %v451_v5  ;;  %v452_v22 = vadd.f32 %v450_v19, %v408_v37 }
 0x135   :  { %v756_v26 = vpop.permute.xlu0 %755 }
 0x136   :  { %v539_v24 = vadd.f32 %v537_v17, %v495_v56  ;;  %v496_v1 = vadd.f32 %v494_v4, %v452_v22 }
 0x138   :  { %v583_v3 = vadd.f32 %v581_v44, %v539_v24  ;;  %v540_v39 = vadd.f32 %v538_v15, %v496_v1 }
 0x13a   :  { %v627_v58 = vadd.f32 %v625_v32, %v583_v3  ;;  %v584_v10 = vadd.f32 %v582_v40, %v540_v39 }
 0x13b   :  { %v758_v62 = vpop.permute.xlu1 %757 }
 0x13c   :  { %v671_v60 = vadd.f32 %v669_v12, %v627_v58  ;;  %v628_v42 = vadd.f32 %v626_v46, %v584_v10 }
 0x13e   :  { %v715_v33 = vadd.f32 %v713_v38, %v671_v60  ;;  %v672_v20 = vadd.f32 %v670_v61, %v628_v42 }
 0x140   :  { %v761_v25 = vadd.f32 %v756_v26, %v715_v33  ;;  %v716_v0 = vadd.f32 %v714_v14, %v672_v20 }
 0x142   :  { %v762_v29 = vadd.f32 %v758_v62, %v716_v0 }
 0x150   :  { %v766_v16 = vpop.permute.xlu0 %765 }
 0x151   :  { %v771_v63 = vadd.f32 %v766_v16, %v761_v25 }
 0x15b   :  { %v768_v27 = vpop.permute.xlu1 %767 }
 0x15c   :  { %v772_v7 = vadd.f32 %v768_v27, %v762_v29 }
 0x163   :  { %v776_v43 = vpop.permute.xlu0 %775 }
 0x164   :  { %v781_v50 = vadd.f32 %v776_v43, %v771_v63 }
 0x171   :  { %v778_v6 = vpop.permute.xlu1 %777 }
 0x172   :  { %v782_v59 = vadd.f32 %v778_v6, %v772_v7 }
 0x176   :  { %v786_v23 = vpop.permute.xlu0 %785 }
 0x177   :  { %v791_v28 = vadd.f32 %v786_v23, %v781_v50 }
 0x183   :  { %v788_v36 = vpop.permute.xlu1 %787 }
 0x184   :  { %v792_v30 = vadd.f32 %v788_v36, %v782_v59 }
 0x18d   :  { %v796_v9 = vpop.permute.xlu0 %795 }
 0x18e   :  { %v801_v49 = vadd.f32 %v796_v9, %v791_v28 }
 0x194   :  { %v798_v48 = vpop.permute.xlu1 %797 }
 0x195   :  { %v802_v52 = vadd.f32 %v798_v48, %v792_v30 }
 0x19b   :  { %v806_v18 = vpop.permute.xlu0 %805 }
 0x19c   :  { %v811_v55 = vadd.f32 %v806_v18, %v801_v49 }
 0x19e   :  { %v943_v35 = vmul.f32 -1.442695, %v811_v55 }
 0x1a0   :  { %959 = vpow2.f32 %v943_v35 }
 0x1a2   :  { %v808_v31 = vpop.permute.xlu1 %807 }
 0x1a3   :  { %v812_v54 = vadd.f32 %v808_v31, %v802_v52 }
 0x1a5   :  { %v944_v45 = vmul.f32 -1.442695, %v812_v54 }
 0x1a7   :  { %961 = vpow2.f32 %v944_v45 }
 0x1ad   :  { %v960_v8 = vpop.eup %959 }
 0x1ae   :  { %v819_v47 = vadd.f32 1.0, %v960_v8 }
 0x1b0   :  { %963 = vrcp.f32 %v819_v47 }
 0x1b4   :  { %v962_v21 = vpop.eup %961 }
 0x1b5   :  { %v820_v2 = vadd.f32 1.0, %v962_v21 }
 0x1b7   :  { %965 = vrcp.f32 %v820_v2 }
 0x1bd   :  { %v964_v34 = vpop.eup %963 }
 0x1be   :  { %826 = vst.msk [vmem:[#allocation8] sm:$0xff] %vm825_vm4, %v964_v34 }
 0x1c4   :  { %v966_v5 = vpop.eup %965 }
 0x1c5   :  { %827 = vst.msk [vmem:[#allocation8 + $0x8] sm:$0xff] %vm825_vm4, %v966_v5 }
 0x1c6   :  { %1010 = shalt.err (!%p1007_p0)
}
 0x1c7   :  { %s2329_s30 = smov 8   ;;  %s2330_s6 = smov 128  }
 0x1c8   :  { %s2331_s12 = sld [smem:[#allocation75_spill]] }
 0x1ce   :  { %839 = dma.vmem_to_hbm [thread:$0]  %s834_s18, 256, %s2331_s12, [#allocation5], %s2330_s6, %s2330_s6, %s2329_s30  }
 0x1cf   :  { %1023 = dma.done.wait [#allocation5], 256  }
 0x1d0   :  { %1024 = vsyncadd [#allocation5], 4294967040 }
 0x1d1   :  { %843 = vsyncpa [#allocation4], 1 }
 0x1d2   :  { %844 = vsyncpa [#allocation5], 1 }
 0x1d3   :  { %845 = vsyncpa [#allocation6], 1 }

</bundles_post_ra>
